<compile_context>
chip_gen: v7x
topology: tpu7x:2x2x1
jax: 0.10.0
libtpu: 0.0.40
codegen_flags: <defaults>
</compile_context>

<pallas_src>
import jax
import jax.numpy as jnp
from jax import lax
from jax.experimental import pallas as pl
from jax.experimental.pallas import tpu as pltpu

_TILE = 256   # row / reduction tile (multiple of (8,128); feeds 256-wide MXU)
_LANE = 128   # lane-dim padding quantum


def _round_up(x, m):
    return (x + m - 1) // m * m


def _sage_layer_kernel(adj_ref, featk_ref, feati_ref, deg_ref,
                       wn_t_ref, wself_t_ref, wnbr_t_ref, out_ref, acc_ref):
    k = pl.program_id(1)

    @pl.when(k == 0)
    def _():
        acc_ref[...] = jnp.zeros_like(acc_ref)

    # Aggregation reduction: acc += adj_tile @ feat_tile (bf16 MXU, f32 acc).
    acc_ref[...] += jnp.dot(adj_ref[...], featk_ref[...],
                            preferred_element_type=jnp.float32)

    @pl.when(k == pl.num_programs(1) - 1)
    def _():
        inv_deg = pl.reciprocal(deg_ref[...])                 # (TM, 1)
        h = (acc_ref[...] * inv_deg).astype(jnp.bfloat16)
        # neigh_linear after aggregation: adj @ (x @ WnT) == (adj @ x) @ WnT
        h = jnp.dot(h, wn_t_ref[...], preferred_element_type=jnp.float32)
        z = (jnp.dot(feati_ref[...], wself_t_ref[...],
                     preferred_element_type=jnp.float32)
             + jnp.dot(h.astype(jnp.bfloat16), wnbr_t_ref[...],
                       preferred_element_type=jnp.float32))
        # F.normalize(p=2, dim=1, eps=1e-12) then relu; eps squared because we
        # feed the sum of squares into rsqrt (EUP slot).
        sumsq = jnp.sum(z * z, axis=1, keepdims=True)
        z = z * lax.rsqrt(jnp.maximum(sumsq, 1e-24))
        out_ref[...] = jnp.maximum(z, 0.0)


def sage_layer(adj_bf16, deg, feats_bf16, wn_t, wself_t, wnbr_t):
    """One SageConvLayer + F.normalize + relu on pre-padded operands.

    adj_bf16:   (Np, Np) bf16, Np % _TILE == 0
    deg:        (Np, 1)  f32   (adj.sum(1) + 1, computed once in the wrapper)
    feats_bf16: (Np, Fp) bf16, Fp % 128 == 0
    wn_t:       (Fp, Fp) bf16  neigh_linear weight, transposed + padded
    wself_t:    (Fp, Op) bf16  linear weight (self half), transposed + padded
    wnbr_t:     (Fp, Op) bf16  linear weight (neigh half), transposed + padded
    returns     (Np, Op) float32
    """
    n_pad, f_pad = feats_bf16.shape
    out_pad = wself_t.shape[1]
    assert n_pad % _TILE == 0 and f_pad % _LANE == 0 and out_pad % _LANE == 0
    n_tiles = n_pad // _TILE

    return pl.pallas_call(
        _sage_layer_kernel,
        out_shape=jax.ShapeDtypeStruct((n_pad, out_pad), jnp.float32),
        grid_spec=pltpu.PrefetchScalarGridSpec(
            num_scalar_prefetch=0,
            grid=(n_tiles, n_tiles),                 # (row tiles, reduction tiles)
            in_specs=[
                pl.BlockSpec((_TILE, _TILE), lambda i, k: (i, k)),    # adj tile
                pl.BlockSpec((_TILE, f_pad), lambda i, k: (k, 0)),    # feats (reduction rows)
                pl.BlockSpec((_TILE, f_pad), lambda i, k: (i, 0)),    # feats (output rows)
                pl.BlockSpec((_TILE, 1), lambda i, k: (i, 0)),        # deg
                pl.BlockSpec((f_pad, f_pad), lambda i, k: (0, 0)),    # WnT (full)
                pl.BlockSpec((f_pad, out_pad), lambda i, k: (0, 0)),  # WselfT (full)
                pl.BlockSpec((f_pad, out_pad), lambda i, k: (0, 0)),  # WnbrT (full)
            ],
            out_specs=pl.BlockSpec((_TILE, out_pad), lambda i, k: (i, 0)),
            scratch_shapes=[pltpu.VMEM((_TILE, f_pad), jnp.float32)],
        ),
        compiler_params=pltpu.CompilerParams(
            dimension_semantics=("parallel", "arbitrary"),
            vmem_limit_bytes=48 << 20,
        ),
    )(adj_bf16, feats_bf16, feats_bf16, deg, wn_t, wself_t, wnbr_t)


def sage_encoder_forward(adj, inputs, params):
    """SAGE encoder stack (GraphSMOTE).  Dropout = identity (eval mode).

    adj:    (N, N) float32 dense 0/1 adjacency
    inputs: (N, F) float32 node features
    params: list of (w_neigh_lin, w_lin) per layer, PyTorch (out, in) layout,
            bias-free (SageConvLayer default is bias=False).
    returns (N, n_hidden) float32
    """
    n, f_in = inputs.shape
    n_pad = _round_up(max(n, 1), _TILE)

    # Pad once, hoist the degree computation out of the per-layer kernels, and
    # cast the adjacency to bf16 once (0/1 -> exact).
    adj_p = jnp.zeros((n_pad, n_pad), jnp.float32).at[:n, :n].set(adj)
    deg = jnp.sum(adj_p, axis=1, keepdims=True) + 1.0
    adj_bf16 = adj_p.astype(jnp.bfloat16)

    f_pad = _round_up(f_in, _LANE)
    h = jnp.zeros((n_pad, f_pad), jnp.bfloat16).at[:n, :f_in].set(
        inputs.astype(jnp.bfloat16))

    out_f32, out_dim = None, None
    for (w_n, w_l) in params:
        out_dim, two_f = w_l.shape
        f = two_f // 2
        f_pad = _round_up(f, _LANE)
        out_pad = _round_up(out_dim, _LANE)
        assert h.shape == (n_pad, f_pad)

        # Pre-transpose + zero-pad weights host-side (no in-kernel .T / XLU work).
        wn_t = (jnp.zeros((f_pad, f_pad), jnp.float32)
                .at[:f, :f].set(w_n.T).astype(jnp.bfloat16))
        wself_t = (jnp.zeros((f_pad, out_pad), jnp.float32)
                   .at[:f, :out_dim].set(w_l[:, :f].T).astype(jnp.bfloat16))
        wnbr_t = (jnp.zeros((f_pad, out_pad), jnp.float32)
                  .at[:f, :out_dim].set(w_l[:, f:].T).astype(jnp.bfloat16))

        out_f32 = sage_layer(adj_bf16, deg, h, wn_t, wself_t, wnbr_t)
        h = out_f32.astype(jnp.bfloat16)     # input to the next layer

    return out_f32[:n, :out_dim]


def _xavier_uniform(key, shape, gain):
    fan_out, fan_in = shape          # PyTorch Linear weight: (out, in)
    bound = gain * (6.0 / (fan_in + fan_out)) ** 0.5
    return jax.random.uniform(key, shape, jnp.float32, -bound, bound)


def make_params(key, in_feats, n_hidden, n_layers):
    gain = 2.0 ** 0.5                # nn.init.calculate_gain('relu')
    params = []
    dims_in = [in_feats] + [n_hidden] * (n_layers - 1)
    for d_in in dims_in:
        key, k1, k2 = jax.random.split(key, 3)
        w_neigh = _xavier_uniform(k1, (d_in, d_in), gain)        # neigh_linear
        w_lin = _xavier_uniform(k2, (n_hidden, 2 * d_in), gain)  # linear
        params.append((w_neigh, w_lin))
    return params


if __name__ == "__main__":
    key = jax.random.PRNGKey(0)
    k_adj, k_x, k_p = jax.random.split(key, 3)

    N = 8          # number of nodes
    IN_FEATS = 16
    N_HIDDEN = 32
    N_LAYERS = 2

    # dense random binary adjacency (symmetric-ish), float32
    a = jax.random.uniform(k_adj, (N, N))
    adj = (a + a.T > 1.0).astype(jnp.float32)

    x = jax.random.normal(k_x, (N, IN_FEATS), dtype=jnp.float32)
    params = make_params(k_p, IN_FEATS, N_HIDDEN, N_LAYERS)

    fwd = jax.jit(sage_encoder_forward)
    out = jax.block_until_ready(fwd(adj, x, params))

    assert out.shape == (N, N_HIDDEN) and out.dtype == jnp.float32
    assert bool(jnp.all(jnp.isfinite(out)))
    print("KERNEL_OK")
</pallas_src>

<mosaic_0001>
module attributes {stable_mosaic.version = 11 : i64} {
  func.func @_sage_layer_kernel(%arg0: i32, %arg1: i32, %arg2: memref<256x256xbf16, #tpu.memory_space<vmem>>, %arg3: memref<256x128xbf16, #tpu.memory_space<vmem>>, %arg4: memref<256x128xbf16, #tpu.memory_space<vmem>>, %arg5: memref<256x1xf32, #tpu.memory_space<vmem>>, %arg6: memref<128x128xbf16, #tpu.memory_space<vmem>>, %arg7: memref<128x128xbf16, #tpu.memory_space<vmem>>, %arg8: memref<128x128xbf16, #tpu.memory_space<vmem>>, %arg9: memref<256x128xf32, #tpu.memory_space<vmem>>, %arg10: memref<256x128xf32, #tpu.memory_space<vmem>>) attributes {dimension_semantics = [#tpu.dimension_semantics<parallel>, #tpu.dimension_semantics<arbitrary>], iteration_bounds = array<i64: 1, 1>, scalar_prefetch = 0 : i64, scratch_operands = 1 : i64, tpu.core_type = #tpu.core_type<tc>, window_params = [{transform_indices = @transform_0, window_bounds = array<i64: 256, 256>}, {transform_indices = @transform_1, window_bounds = array<i64: 256, 128>}, {transform_indices = @transform_2, window_bounds = array<i64: 256, 128>}, {transform_indices = @transform_3, window_bounds = array<i64: 256, 1>}, {pipeline_mode = #tpu.pipeline_mode<synchronous>, transform_indices = @transform_4, window_bounds = array<i64: 128, 128>}, {pipeline_mode = #tpu.pipeline_mode<synchronous>, transform_indices = @transform_5, window_bounds = array<i64: 128, 128>}, {pipeline_mode = #tpu.pipeline_mode<synchronous>, transform_indices = @transform_6, window_bounds = array<i64: 128, 128>}, {transform_indices = @transform_7, window_bounds = array<i64: 256, 128>}]} {
    %c0_i32 = arith.constant 0 : i32
    %0 = arith.cmpi eq, %arg1, %c0_i32 : i32
    %1 = arith.extui %0 : i1 to i32
    %c0_i32_0 = arith.constant 0 : i32
    %2 = arith.cmpi ne, %1, %c0_i32_0 : i32
    scf.if %2 {
      %cst_10 = arith.constant 0.000000e+00 : f32
      %12 = vector.broadcast %cst_10 : f32 to vector<256x128xf32>
      %c0_11 = arith.constant 0 : index
      %c0_12 = arith.constant 0 : index
      %13 = vector.load %arg10[%c0_11, %c0_12] : memref<256x128xf32, #tpu.memory_space<vmem>>, vector<256x128xf32>
      tpu.vector_store %arg10[%c0_11, %c0_12], %12 {strides = array<i32>} : memref<256x128xf32, #tpu.memory_space<vmem>>, vector<256x128xf32>,
    } else {
    }
    %c0 = arith.constant 0 : index
    %c0_1 = arith.constant 0 : index
    %3 = vector.load %arg10[%c0, %c0_1] : memref<256x128xf32, #tpu.memory_space<vmem>>, vector<256x128xf32>
    %c0_2 = arith.constant 0 : index
    %c0_3 = arith.constant 0 : index
    %4 = vector.load %arg2[%c0_2, %c0_3] : memref<256x256xbf16, #tpu.memory_space<vmem>>, vector<256x256xbf16>
    %c0_4 = arith.constant 0 : index
    %c0_5 = arith.constant 0 : index
    %5 = vector.load %arg3[%c0_4, %c0_5] : memref<256x128xbf16, #tpu.memory_space<vmem>>, vector<256x128xbf16>
    %cst = arith.constant dense<0.000000e+00> : vector<256x128xf32>
    %6 = tpu.matmul %4, %5, %cst {dimension_numbers = #tpu.dot_dimension_numbers<[1], [0], [0], [1], [0, 0, 1, 1], [], []>} : vector<256x256xbf16>, vector<256x128xbf16>, vector<256x128xf32> -> vector<256x128xf32>
    %7 = arith.addf %3, %6 : vector<256x128xf32>
    %c0_6 = arith.constant 0 : index
    %c0_7 = arith.constant 0 : index
    %8 = vector.load %arg10[%c0_6, %c0_7] : memref<256x128xf32, #tpu.memory_space<vmem>>, vector<256x128xf32>
    tpu.vector_store %arg10[%c0_6, %c0_7], %7 {strides = array<i32>} : memref<256x128xf32, #tpu.memory_space<vmem>>, vector<256x128xf32>,
    %c0_i32_8 = arith.constant 0 : i32
    %9 = arith.cmpi eq, %arg1, %c0_i32_8 : i32
    %10 = arith.extui %9 : i1 to i32
    %c0_i32_9 = arith.constant 0 : i32
    %11 = arith.cmpi ne, %10, %c0_i32_9 : i32
    scf.if %11 {
      %c0_10 = arith.constant 0 : index
      %c0_11 = arith.constant 0 : index
      %12 = vector.load %arg5[%c0_10, %c0_11] : memref<256x1xf32, #tpu.memory_space<vmem>>, vector<256x1xf32>
      %13 = tpu.reciprocal %12 : vector<256x1xf32> -> vector<256x1xf32>
      %c0_12 = arith.constant 0 : index
      %c0_13 = arith.constant 0 : index
      %14 = vector.load %arg10[%c0_12, %c0_13] : memref<256x128xf32, #tpu.memory_space<vmem>>, vector<256x128xf32>
      %15 = vector.broadcast %13 : vector<256x1xf32> to vector<256x128xf32>
      %16 = arith.mulf %14, %15 : vector<256x128xf32>
      %17 = arith.truncf %16 : vector<256x128xf32> to vector<256x128xbf16>
      %c0_14 = arith.constant 0 : index
      %c0_15 = arith.constant 0 : index
      %18 = vector.load %arg6[%c0_14, %c0_15] : memref<128x128xbf16, #tpu.memory_space<vmem>>, vector<128x128xbf16>
      %cst_16 = arith.constant dense<0.000000e+00> : vector<256x128xf32>
      %19 = tpu.matmul %17, %18, %cst_16 {dimension_numbers = #tpu.dot_dimension_numbers<[1], [0], [0], [1], [0, 0, 1, 1], [], []>} : vector<256x128xbf16>, vector<128x128xbf16>, vector<256x128xf32> -> vector<256x128xf32>
      %c0_17 = arith.constant 0 : index
      %c0_18 = arith.constant 0 : index
      %20 = vector.load %arg4[%c0_17, %c0_18] : memref<256x128xbf16, #tpu.memory_space<vmem>>, vector<256x128xbf16>
      %c0_19 = arith.constant 0 : index
      %c0_20 = arith.constant 0 : index
      %21 = vector.load %arg7[%c0_19, %c0_20] : memref<128x128xbf16, #tpu.memory_space<vmem>>, vector<128x128xbf16>
      %cst_21 = arith.constant dense<0.000000e+00> : vector<256x128xf32>
      %22 = tpu.matmul %20, %21, %cst_21 {dimension_numbers = #tpu.dot_dimension_numbers<[1], [0], [0], [1], [0, 0, 1, 1], [], []>} : vector<256x128xbf16>, vector<128x128xbf16>, vector<256x128xf32> -> vector<256x128xf32>
      %23 = arith.truncf %19 : vector<256x128xf32> to vector<256x128xbf16>
      %c0_22 = arith.constant 0 : index
      %c0_23 = arith.constant 0 : index
      %24 = vector.load %arg8[%c0_22, %c0_23] : memref<128x128xbf16, #tpu.memory_space<vmem>>, vector<128x128xbf16>
      %cst_24 = arith.constant dense<0.000000e+00> : vector<256x128xf32>
      %25 = tpu.matmul %23, %24, %cst_24 {dimension_numbers = #tpu.dot_dimension_numbers<[1], [0], [0], [1], [0, 0, 1, 1], [], []>} : vector<256x128xbf16>, vector<128x128xbf16>, vector<256x128xf32> -> vector<256x128xf32>
      %26 = arith.addf %22, %25 : vector<256x128xf32>
      %27 = arith.mulf %26, %26 : vector<256x128xf32>
      %cst_25 = arith.constant dense<0.000000e+00> : vector<256xf32>
      %28 = vector.multi_reduction <add>, %27, %cst_25 [1] : vector<256x128xf32> to vector<256xf32>
      %29 = vector.shape_cast %28 : vector<256xf32> to vector<256x1xf32>
      %cst_26 = arith.constant 1.000000e-24 : f32
      %30 = vector.broadcast %cst_26 : f32 to vector<256x1xf32>
      %31 = arith.maximumf %29, %30 : vector<256x1xf32>
      %32 = math.rsqrt %31 : vector<256x1xf32>
      %33 = vector.broadcast %32 : vector<256x1xf32> to vector<256x128xf32>
      %34 = arith.mulf %26, %33 : vector<256x128xf32>
      %cst_27 = arith.constant 0.000000e+00 : f32
      %35 = vector.broadcast %cst_27 : f32 to vector<256x128xf32>
      %36 = arith.maximumf %34, %35 : vector<256x128xf32>
      %c0_28 = arith.constant 0 : index
      %c0_29 = arith.constant 0 : index
      %37 = vector.load %arg9[%c0_28, %c0_29] : memref<256x128xf32, #tpu.memory_space<vmem>>, vector<256x128xf32>
      tpu.vector_store %arg9[%c0_28, %c0_29], %36 {strides = array<i32>} : memref<256x128xf32, #tpu.memory_space<vmem>>, vector<256x128xf32>,
    } else {
    }
    return
  }
  func.func @transform_0(%arg0: i32, %arg1: i32) -> (i32, i32) {
    %c0_i32 = arith.constant 0 : i32
    return %arg0, %arg1 : i32, i32
  }
  func.func @transform_1(%arg0: i32, %arg1: i32) -> (i32, i32) {
    %c0_i32 = arith.constant 0 : i32
    %c0_i32_0 = arith.constant 0 : i32
    return %arg1, %c0_i32 : i32, i32
  }
  func.func @transform_2(%arg0: i32, %arg1: i32) -> (i32, i32) {
    %c0_i32 = arith.constant 0 : i32
    %c0_i32_0 = arith.constant 0 : i32
    return %arg0, %c0_i32 : i32, i32
  }
  func.func @transform_3(%arg0: i32, %arg1: i32) -> (i32, i32) {
    %c0_i32 = arith.constant 0 : i32
    %c0_i32_0 = arith.constant 0 : i32
    return %arg0, %c0_i32 : i32, i32
  }
  func.func @transform_4(%arg0: i32, %arg1: i32) -> (i32, i32) {
    %c0_i32 = arith.constant 0 : i32
    %c0_i32_0 = arith.constant 0 : i32
    %c0_i32_1 = arith.constant 0 : i32
    return %c0_i32, %c0_i32_0 : i32, i32
  }
  func.func @transform_5(%arg0: i32, %arg1: i32) -> (i32, i32) {
    %c0_i32 = arith.constant 0 : i32
    %c0_i32_0 = arith.constant 0 : i32
    %c0_i32_1 = arith.constant 0 : i32
    return %c0_i32, %c0_i32_0 : i32, i32
  }
  func.func @transform_6(%arg0: i32, %arg1: i32) -> (i32, i32) {
    %c0_i32 = arith.constant 0 : i32
    %c0_i32_0 = arith.constant 0 : i32
    %c0_i32_1 = arith.constant 0 : i32
    return %c0_i32, %c0_i32_0 : i32, i32
  }
  func.func @transform_7(%arg0: i32, %arg1: i32) -> (i32, i32) {
    %c0_i32 = arith.constant 0 : i32
    %c0_i32_0 = arith.constant 0 : i32
    return %arg0, %c0_i32 : i32, i32
  }
}

</mosaic_0001>

<bundles_post_ra>
// kernel: sage_encoder_forward.2
= control target key start
LH: loop header
LB: loop body
LE: loop exit
PB: predicated region body
PF: predicated region fallthrough
CT: control target
= control target key end

     0   :  { %v2725_v1 = vmov 0   ;;  %s3386_s1 = inlined_call_operand.vmem [shape: bf16[256,128], index: 1, kind: input, shape index: {}, may-alias: {1,2}]   ;;  %s3387_s0 = inlined_call_operand.vmem [shape: bf16[256,256], index: 0, kind: input, shape index: {}]   ;;  %s3388_s3 = inlined_call_operand.vmem [shape: f32[256,1], index: 3, kind: input, shape index: {}]   ;;  %s3389_s4 = inlined_call_operand.vmem [shape: bf16[128,128], index: 4, kind: input, shape index: {}]   ;;  %s3390_s6 = inlined_call_operand.vmem [shape: bf16[128,128], index: 6, kind: input, shape index: {}]   ;;  %s3391_s5 = inlined_call_operand.vmem [shape: bf16[128,128], index: 5, kind: input, shape index: {}]   ;;  %s3392_s2 = inlined_call_operand.vmem [shape: bf16[256,128], index: 2, kind: input, shape index: {}, may-alias: {1,2}]   ;;  %s3393_s7 = inlined_call_operand.vmem [shape: f32[256,128], index: 7, kind: output, shape index: {}]  }
   0x1   :  { %v2493_v0 = vld [vmem:[%s3386_s1 + $0x40] sm:$0xff]   ;;  %2491 = vset.pattern.permute.xlu0 %v2725_v1  ;;  %2492 = vset.pattern.permute.xlu1 %v2725_v1  ;;  %v2495_v3 = vld [vmem:[%s3386_s1 + $0x48] sm:$0xff]   ;;  %v2497_v5 = vld [vmem:[%s3386_s1 + $0x50] sm:$0xff]  }
   0x2   :  { %v2494_v2 = vld [vmem:[%s3386_s1] sm:$0xff]   ;;  %2114 = vmatprep.subr.bf16.mxu0 %v2493_v0  ;;  %v2496_v4 = vld [vmem:[%s3386_s1 + $0x8] sm:$0xff]   ;;  %v2498_v6 = vld [vmem:[%s3386_s1 + $0x10] sm:$0xff]  }
   0x3   :  { %2115 = vmatpush3.bf16.msra.mxu0 %v2494_v2  ;;  %v2499_v7 = vld [vmem:[%s3386_s1 + $0x58] sm:$0xff]   ;;  %v2501_v9 = vld [vmem:[%s3386_s1 + $0x60] sm:$0xff]   ;;  %v2503_v11 = vld [vmem:[%s3386_s1 + $0x68] sm:$0xff]  }
   0x4   :  { %2116 = vmatprep.subr.bf16.mxu0 %v2495_v3  ;;  %v2500_v8 = vld [vmem:[%s3386_s1 + $0x18] sm:$0xff]   ;;  %v2502_v10 = vld [vmem:[%s3386_s1 + $0x20] sm:$0xff]   ;;  %v2504_v13 = vld [vmem:[%s3386_s1 + $0x28] sm:$0xff]  }
   0x5   :  { %v2511_v12 = vld [vmem:[%s3387_s0 + $0x4] ss:$8 sps:$4 sm:$0xff]   ;;  %v2505_v14 = vld [vmem:[%s3386_s1 + $0x70] sm:$0xff]   ;;  %v2507_v16 = vld [vmem:[%s3386_s1 + $0x78] sm:$0xff]  }
   0x6   :  { %447 = vmatprep.mubr.bf16.mxu0 %v2511_v12  ;;  %v2506_v15 = vld [vmem:[%s3386_s1 + $0x30] sm:$0xff]   ;;  %v2508_v17 = vld [vmem:[%s3386_s1 + $0x38] sm:$0xff]   ;;  %v2509_v18 = vld [vmem:[%s3387_s0] ss:$8 sps:$4 sm:$0xff]  }
   0x7   :  { %2117 = vmatpush3.bf16.msra.mxu0 %v2496_v4  ;;  %v643_v19 = vld [vmem:[%s3388_s3] sm:$0xff]  ;;  %v2512_v20 = vld [vmem:[%s3387_s0 + $0x14] ss:$8 sps:$4 sm:$0xff]   ;;  %v644_v22 = vld [vmem:[%s3388_s3 + $0x8] sm:$0xff] }
   0x8   :  { %2118 = vmatprep.subr.bf16.mxu0 %v2497_v5  ;;  %2597 = vrcp.f32 %v643_v19  ;;  %v645_v21 = vld [vmem:[%s3388_s3 + $0x10] sm:$0xff]  ;;  %v646_v23 = vld [vmem:[%s3388_s3 + $0x18] sm:$0xff]  ;;  %v647_v24 = vld [vmem:[%s3388_s3 + $0x20] sm:$0xff] }
   0x9   :  { %2599 = vrcp.f32 %v645_v21  ;;  %v648_v25 = vld [vmem:[%s3388_s3 + $0x28] sm:$0xff]  ;;  %v2514_v26 = vld [vmem:[%s3387_s0 + $0x10] ss:$8 sps:$4 sm:$0xff]   ;;  %v651_v31 = vld [vmem:[%s3388_s3 + $0x40] sm:$0xff] }
   0xa   :  { %2601 = vrcp.f32 %v644_v22  ;;  %v649_v27 = vld [vmem:[%s3388_s3 + $0x30] sm:$0xff]  ;;  %v2515_v28 = vld [vmem:[%s3387_s0 + $0x24] ss:$8 sps:$4 sm:$0xff]   ;;  %v650_v29 = vld [vmem:[%s3388_s3 + $0x38] sm:$0xff] }
   0xb   :  { %2119 = vmatpush3.bf16.msra.mxu0 %v2498_v6  ;;  %2603 = vrcp.f32 %v646_v23  ;;  %v652_v34 = vld [vmem:[%s3388_s3 + $0x48] sm:$0xff]  ;;  %v653_v37 = vld [vmem:[%s3388_s3 + $0x50] sm:$0xff]  ;;  %v654_v40 = vld [vmem:[%s3388_s3 + $0x58] sm:$0xff] }
   0xc   :  { %2120 = vmatprep.subr.bf16.mxu0 %v2499_v7  ;;  %2605 = vrcp.f32 %v647_v24  ;;  %v2517_v36 = vld [vmem:[%s3387_s0 + $0x20] ss:$8 sps:$4 sm:$0xff]   ;;  %v2518_v39 = vld [vmem:[%s3387_s0 + $0x34] ss:$8 sps:$4 sm:$0xff]   ;;  %v2520_v48 = vld [vmem:[%s3387_s0 + $0x30] ss:$8 sps:$4 sm:$0xff]  }
   0xd   :  { %2607 = vrcp.f32 %v648_v25  ;;  %v655_v41 = vld [vmem:[%s3388_s3 + $0x60] sm:$0xff]  ;;  %v2558_v44 = vld [vmem:[%s3389_s4 + $0x8] sm:$0xff]   ;;  %v2559_v47 = vld [vmem:[%s3389_s4 + $0x10] sm:$0xff]  }
   0xe   :  { %2609 = vrcp.f32 %v649_v27  ;;  %v2557_v42 = vld [vmem:[%s3389_s4] sm:$0xff]   ;;  %v656_v45 = vld [vmem:[%s3388_s3 + $0x68] sm:$0xff]  ;;  %v657_v50 = vld [vmem:[%s3388_s3 + $0x70] sm:$0xff] }
   0xf   :  { %2121 = vmatpush3.bf16.msra.mxu0 %v2500_v8  ;;  %2611 = vrcp.f32 %v650_v29  ;;  %2442 = vmatprep.subr.bf16.mxu1 %v2557_v42  ;;  %v2521_v52 = vld [vmem:[%s3387_s0 + $0x44] ss:$8 sps:$4 sm:$0xff]   ;;  %v658_v53 = vld [vmem:[%s3388_s3 + $0x78] sm:$0xff]  ;;  %v2523_v60 = vld [vmem:[%s3387_s0 + $0x40] ss:$8 sps:$4 sm:$0xff]  }
  0x10   :  { %2122 = vmatprep.subr.bf16.mxu0 %v2501_v9  ;;  %2613 = vrcp.f32 %v651_v31  ;;  %2450 = vmatpush3.bf16.msra.mxu1 %v2557_v42  ;;  %v2560_v55 = vld [vmem:[%s3389_s4 + $0x18] sm:$0xff]   ;;  %v659_v56 = vld [vmem:[%s3388_s3 + $0x80] sm:$0xff]  ;;  %v660_v58 = vld [vmem:[%s3388_s3 + $0x88] sm:$0xff] }
  0x11   :  { %2615 = vrcp.f32 %v652_v34  ;;  %2443 = vmatprep.subr.bf16.mxu1 %v2558_v44  ;;  %v661_v61 = vld [vmem:[%s3388_s3 + $0x90] sm:$0xff]  ;;  %v662_v0 = vld [vmem:[%s3388_s3 + $0x98] sm:$0xff]  ;;  %v663_v2 = vld [vmem:[%s3388_s3 + $0xa0] sm:$0xff] }
  0x12   :  { %v2598_v30 = vpop.eup %2597  ;;  %2617 = vrcp.f32 %v653_v37  ;;  %v2524_v63 = vld [vmem:[%s3387_s0 + $0x54] ss:$8 sps:$4 sm:$0xff]   ;;  %v664_v4 = vld [vmem:[%s3388_s3 + $0xa8] sm:$0xff]  ;;  %v2526_v6 = vld [vmem:[%s3387_s0 + $0x50] ss:$8 sps:$4 sm:$0xff]  }
  0x13   :  { %2123 = vmatpush3.bf16.msra.mxu0 %v2502_v10  ;;  %741 = vperm.xlu0 %2491, %v2598_v30   ;;  %v2600_v32 = vpop.eup %2599  ;;  %2619 = vrcp.f32 %v654_v40  ;;  %v665_v7 = vld [vmem:[%s3388_s3 + $0xb0] sm:$0xff]  ;;  %v2527_v9 = vld [vmem:[%s3387_s0 + $0x64] ss:$8 sps:$4 sm:$0xff]   ;;  %v666_v10 = vld [vmem:[%s3388_s3 + $0xb8] sm:$0xff] }
  0x14   :  { %2124 = vmatprep.subr.bf16.mxu0 %v2503_v11  ;;  %v2602_v33 = vpop.eup %2601  ;;  %751 = vperm.xlu1 %2492, %v2600_v32   ;;  %2621 = vrcp.f32 %v655_v41  ;;  %v667_v12 = vld [vmem:[%s3388_s3 + $0xc0] sm:$0xff]  ;;  %v2530_v19 = vld [vmem:[%s3387_s0 + $0x74] ss:$8 sps:$4 sm:$0xff]   ;;  %v672_v24 = vld [vmem:[%s3388_s3 + $0xe8] sm:$0xff] }
  0x15   :  { %v2604_v35 = vpop.eup %2603  ;;  %2623 = vrcp.f32 %v656_v45  ;;  %2451 = vmatpush3.bf16.msra.mxu1 %v2558_v44  ;;  %v671_v22 = vld [vmem:[%s3388_s3 + $0xe0] sm:$0xff]  ;;  %v673_v27 = vld [vmem:[%s3388_s3 + $0xf0] sm:$0xff]  ;;  %v674_v30 = vld [vmem:[%s3388_s3 + $0xf8] sm:$0xff] }
  0x16   :  { %v2606_v38 = vpop.eup %2605  ;;  %2625 = vrcp.f32 %v657_v50  ;;  %2444 = vmatprep.subr.bf16.mxu1 %v2559_v47  ;;  %v2533_v29 = vld [vmem:[%s3387_s0 + $0x84] ss:$8 sps:$4 sm:$0xff]   ;;  %v2535_v34 = vld [vmem:[%s3387_s0 + $0x80] ss:$8 sps:$4 sm:$0xff]   ;;  %v2538_v40 = vld [vmem:[%s3387_s0 + $0x90] ss:$8 sps:$4 sm:$0xff]  }
  0x17   :  { %2125 = vmatpush3.bf16.msra.mxu0 %v2504_v13  ;;  %746 = vperm.xlu0 %2491, %v2602_v33   ;;  %v2608_v43 = vpop.eup %2607  ;;  %2627 = vrcp.f32 %v658_v53  ;;  %v2539_v41 = vld [vmem:[%s3387_s0 + $0xa4] ss:$8 sps:$4 sm:$0xff]   ;;  %v2544_v45 = vld [vmem:[%s3387_s0 + $0xb0] ss:$8 sps:$4 sm:$0xff]   ;;  %v2548_v50 = vld [vmem:[%s3387_s0 + $0xd4] ss:$8 sps:$4 sm:$0xff]  }
  0x18   :  { %2126 = vmatprep.subr.bf16.mxu0 %v2505_v14  ;;  %756 = vperm.xlu1 %2492, %v2604_v35   ;;  %v2610_v46 = vpop.eup %2609  ;;  %2629 = vrcp.f32 %v659_v56  ;;  %v668_v14 = vld [vmem:[%s3388_s3 + $0xc8] sm:$0xff]  ;;  %v2556_v56 = vld [vmem:[%s3387_s0 + $0xf0] ss:$8 sps:$4 sm:$0xff]  }
  0x19   :  { %v2612_v49 = vpop.eup %2611  ;;  %2631 = vrcp.f32 %v660_v58  ;;  %2452 = vmatpush3.bf16.msra.mxu1 %v2559_v47  ;;  %v2551_v53 = vld [vmem:[%s3387_s0 + $0xe4] ss:$8 sps:$4 sm:$0xff]  }
  0x1a   :  { %v2614_v51 = vpop.eup %2613  ;;  %2633 = vrcp.f32 %v661_v61  ;;  %2445 = vmatprep.subr.bf16.mxu1 %v2560_v55 }
  0x1b   :  { %2127 = vmatpush3.bf16.msra.mxu0 %v2506_v15  ;;  %761 = vperm.xlu0 %2491, %v2606_v38   ;;  %v2616_v54 = vpop.eup %2615  ;;  %2635 = vrcp.f32 %v662_v0  ;;  %v3033_v0 = vld [vmem:[%s3390_s6] sm:$0xff]  }
  0x1c   :  { %2128 = vmatprep.subr.bf16.mxu0 %v2507_v16  ;;  %766 = vperm.xlu1 %2492, %v2608_v43   ;;  %v2618_v57 = vpop.eup %2617  ;;  %2637 = vrcp.f32 %v663_v2  ;;  %v2529_v16 = vld [vmem:[%s3387_s0 + $0x60] ss:$8 sps:$4 sm:$0xff]   ;;  %v2542_v43 = vld [vmem:[%s3387_s0 + $0xb4] ss:$8 sps:$4 sm:$0xff]  }
  0x1d   :  { %v2620_v59 = vpop.eup %2619  ;;  %2453 = vmatpush3.bf16.msra.mxu1 %v2560_v55  ;;  %2639 = vrcp.f32 %v664_v4 }
  0x1e   :  { %v2622_v62 = vpop.eup %2621  ;;  %2641 = vrcp.f32 %v665_v7 }
  0x1f   :  { %2129 = vmatpush3.bf16.msra.mxu0 %v2508_v17  ;;  %771 = vperm.xlu0 %2491, %v2610_v46   ;;  %v2624_v1 = vpop.eup %2623  ;;  %2643 = vrcp.f32 %v666_v10  ;;  %v669_v17 = vld [vmem:[%s3388_s3 + $0xd0] sm:$0xff]  ;;  %v2545_v46 = vld [vmem:[%s3387_s0 + $0xc4] ss:$8 sps:$4 sm:$0xff]  }
  0x20   :  { %2298 = vmatprep.subr.bf16.mxu0 %v2557_v42  ;;  %776 = vperm.xlu1 %2492, %v2612_v49   ;;  %v2626_v3 = vpop.eup %2625  ;;  %2645 = vrcp.f32 %v667_v12  ;;  %v2547_v49 = vld [vmem:[%s3387_s0 + $0xc0] ss:$8 sps:$4 sm:$0xff]  }
  0x21   :  { %v2628_v5 = vpop.eup %2627  ;;  %2647 = vrcp.f32 %v668_v14 }
  0x22   :  { %448 = vmatmul.mubr.bf16.vlgmr.msra.gmra.mrb[0].mxu0 %v2509_v18  ;;  %v2630_v8 = vpop.eup %2629  ;;  %2649 = vrcp.f32 %v669_v17 }
  0x23   :  { %455 = vmatprep.mubr.bf16.mxu0 %v2512_v20  ;;  %2299 = vmatpush3.bf16.msra.mxu0 %v2557_v42  ;;  %v2632_v11 = vpop.eup %2631  ;;  %v670_v20 = vld [vmem:[%s3388_s3 + $0xd8] sm:$0xff]  ;;  %v2541_v42 = vld [vmem:[%s3387_s0 + $0xa0] ss:$8 sps:$4 sm:$0xff]  }
  0x24   :  { %2300 = vmatprep.subr.bf16.mxu0 %v2558_v44  ;;  %781 = vperm.xlu0 %2491, %v2614_v51   ;;  %v2634_v13 = vpop.eup %2633  ;;  %2651 = vrcp.f32 %v670_v20  ;;  %v2564_v51 = vld [vmem:[%s3389_s4 + $0x38] sm:$0xff]  }
  0x25   :  { %786 = vperm.xlu1 %2492, %v2616_v54   ;;  %v2636_v15 = vpop.eup %2635  ;;  %2653 = vrcp.f32 %v671_v22  ;;  %v2553_v54 = vld [vmem:[%s3387_s0 + $0xe0] ss:$8 sps:$4 sm:$0xff]  }
  0x26   :  { %v2638_v18 = vpop.eup %2637  ;;  %2655 = vrcp.f32 %v672_v24 }
  0x27   :  { %2301 = vmatpush3.bf16.msra.mxu0 %v2558_v44  ;;  %v2640_v21 = vpop.eup %2639  ;;  %2657 = vrcp.f32 %v673_v27  ;;  %v2561_v44 = vld [vmem:[%s3389_s4 + $0x20] sm:$0xff]  }
  0x28   :  { %2302 = vmatprep.subr.bf16.mxu0 %v2559_v47  ;;  %791 = vperm.xlu0 %2491, %v2618_v57   ;;  %v2642_v23 = vpop.eup %2641  ;;  %2659 = vrcp.f32 %v674_v30 }
  0x29   :  { %796 = vperm.xlu1 %2492, %v2620_v59   ;;  %v2644_v25 = vpop.eup %2643  ;;  %2446 = vmatprep.subr.bf16.mxu1 %v2561_v44 }
  0x2a   :  { %456 = vmatmul.mubr.bf16.gmra.mrb[4].mxu0 %v2514_v26  ;;  %v2532_v26 = vld [vmem:[%s3387_s0 + $0x70] ss:$8 sps:$4 sm:$0xff]   ;;  %2454 = vmatpush3.bf16.msra.mxu1 %v2561_v44 }
  0x2b   :  { %463 = vmatprep.mubr.bf16.mxu0 %v2515_v28  ;;  %2303 = vmatpush3.bf16.msra.mxu0 %v2559_v47  ;;  %v2646_v28 = vpop.eup %2645  ;;  %v2562_v47 = vld [vmem:[%s3389_s4 + $0x28] sm:$0xff]  }
  0x2c   :  { %2304 = vmatprep.subr.bf16.mxu0 %v2560_v55  ;;  %801 = vperm.xlu0 %2491, %v2622_v62   ;;  %v2648_v31 = vpop.eup %2647 }
  0x2d   :  { %806 = vperm.xlu1 %2492, %v2624_v1   ;;  %v2650_v32 = vpop.eup %2649  ;;  %2447 = vmatprep.subr.bf16.mxu1 %v2562_v47 }
  0x2e   :  { %v2652_v33 = vpop.eup %2651  ;;  %2455 = vmatpush3.bf16.msra.mxu1 %v2562_v47 }
  0x2f   :  { %2305 = vmatpush3.bf16.msra.mxu0 %v2560_v55  ;;  %v2654_v35 = vpop.eup %2653  ;;  %v2554_v55 = vld [vmem:[%s3387_s0 + $0xf4] ss:$8 sps:$4 sm:$0xff]  }
  0x30   :  { %811 = vperm.xlu0 %2491, %v2626_v3   ;;  %v2656_v37 = vpop.eup %2655  ;;  %2306 = vmatprep.subr.bf16.mxu0 %v2561_v44 }
  0x31   :  { %816 = vperm.xlu1 %2492, %v2628_v5   ;;  %v2658_v38 = vpop.eup %2657 }
  0x32   :  { %464 = vmatmul.mubr.bf16.gmra.mrb[8].mxu0 %v2517_v36  ;;  %v2536_v36 = vld [vmem:[%s3387_s0 + $0x94] ss:$8 sps:$4 sm:$0xff]  }
  0x33   :  { %471 = vmatprep.mubr.bf16.mxu0 %v2518_v39  ;;  %v2660_v39 = vpop.eup %2659  ;;  %2307 = vmatpush3.bf16.msra.mxu0 %v2561_v44 }
  0x34   :  { %821 = vperm.xlu0 %2491, %v2630_v8   ;;  %2308 = vmatprep.subr.bf16.mxu0 %v2562_v47 }
  0x35   :  { %826 = vperm.xlu1 %2492, %v2632_v11  }
  0x37   :  { %2309 = vmatpush3.bf16.msra.mxu0 %v2562_v47 }
  0x38   :  { %831 = vperm.xlu0 %2491, %v2634_v13  }
  0x39   :  { %836 = vperm.xlu1 %2492, %v2636_v15  }
  0x3a   :  { %472 = vmatmul.mubr.bf16.gmra.mrb[12].mxu0 %v2520_v48  ;;  %v2563_v48 = vld [vmem:[%s3389_s4 + $0x30] sm:$0xff]  }
  0x3b   :  { %479 = vmatprep.mubr.bf16.mxu0 %v2521_v52  ;;  %2310 = vmatprep.subr.bf16.mxu0 %v2563_v48  ;;  %v2550_v52 = vld [vmem:[%s3387_s0 + $0xd0] ss:$8 sps:$4 sm:$0xff]  }
  0x3c   :  { %841 = vperm.xlu0 %2491, %v2638_v18   ;;  %2448 = vmatprep.subr.bf16.mxu1 %v2563_v48 }
  0x3d   :  { %846 = vperm.xlu1 %2492, %v2640_v21   ;;  %2311 = vmatpush3.bf16.msra.mxu0 %v2563_v48 }
  0x3e   :  { %2456 = vmatpush3.bf16.msra.mxu1 %v2563_v48  ;;  %2312 = vmatprep.subr.bf16.mxu0 %v2564_v51 }
  0x3f   :  { %2449 = vmatprep.subr.bf16.mxu1 %v2564_v51 }
  0x40   :  { %851 = vperm.xlu0 %2491, %v2642_v23  }
  0x41   :  { %856 = vperm.xlu1 %2492, %v2644_v25   ;;  %2313 = vmatpush3.bf16.msra.mxu0 %v2564_v51 }
  0x42   :  { %480 = vmatmul.mubr.bf16.gmra.mrb[16].mxu0 %v2523_v60  ;;  %2457 = vmatpush3.bf16.msra.mxu1 %v2564_v51 }
  0x43   :  { %487 = vmatprep.mubr.bf16.mxu0 %v2524_v63  ;;  %2346 = vmatprep.subr.bf16.mxu1 %v3033_v0 }
  0x44   :  { %861 = vperm.xlu0 %2491, %v2646_v28  }
  0x45   :  { %866 = vperm.xlu1 %2492, %v2648_v31  }
  0x48   :  { %871 = vperm.xlu0 %2491, %v2650_v32  }
  0x49   :  { %876 = vperm.xlu1 %2492, %v2652_v33  }
  0x4a   :  { %488 = vmatmul.mubr.bf16.gmra.mrb[20].mxu0 %v2526_v6 }
  0x4b   :  { %495 = vmatprep.mubr.bf16.mxu0 %v2527_v9 }
  0x4c   :  { %881 = vperm.xlu0 %2491, %v2654_v35  }
  0x4d   :  { %886 = vperm.xlu1 %2492, %v2656_v37  }
  0x50   :  { %891 = vperm.xlu0 %2491, %v2658_v38  }
  0x51   :  { %896 = vperm.xlu1 %2492, %v2660_v39  }
  0x52   :  { %496 = vmatmul.mubr.bf16.gmra.mrb[24].mxu0 %v2529_v16 }
  0x53   :  { %503 = vmatprep.mubr.bf16.mxu0 %v2530_v19 }
  0x5a   :  { %504 = vmatmul.mubr.bf16.gmra.mrb[28].mxu0 %v2532_v26 }
  0x5b   :  { %511 = vmatprep.mubr.bf16.mxu0 %v2533_v29 }
  0x62   :  { %512 = vmatmul.mubr.bf16.gmra.mrb[32].mxu0 %v2535_v34 }
  0x63   :  { %519 = vmatprep.mubr.bf16.mxu0 %v2536_v36 }
  0x6a   :  { %520 = vmatmul.mubr.bf16.gmra.mrb[36].mxu0 %v2538_v40 }
  0x6b   :  { %527 = vmatprep.mubr.bf16.mxu0 %v2539_v41 }
  0x72   :  { %528 = vmatmul.mubr.bf16.gmra.mrb[40].mxu0 %v2541_v42 }
  0x73   :  { %535 = vmatprep.mubr.bf16.mxu0 %v2542_v43 }
  0x7a   :  { %536 = vmatmul.mubr.bf16.gmra.mrb[44].mxu0 %v2544_v45 }
  0x7b   :  { %543 = vmatprep.mubr.bf16.mxu0 %v2545_v46 }
  0x82   :  { %544 = vmatmul.mubr.bf16.gmra.mrb[48].mxu0 %v2547_v49 }
  0x83   :  { %551 = vmatprep.mubr.bf16.mxu0 %v2548_v50 }
  0x8a   :  { %552 = vmatmul.mubr.bf16.gmra.mrb[52].mxu0 %v2550_v52 }
  0x8b   :  { %559 = vmatprep.mubr.bf16.mxu0 %v2551_v53 }
  0x92   :  { %560 = vmatmul.mubr.bf16.gmra.mrb[56].mxu0 %v2553_v54  ;;  %v742_v57 = vpop.permute.xlu0 %741 }
  0x93   :  { %567 = vmatprep.mubr.bf16.mxu0 %v2554_v55  ;;  %v752_v4 = vpop.permute.xlu1 %751 }
  0x96   :  { %v747_v63 = vpop.permute.xlu0 %746 }
  0x97   :  { %v757_v12 = vpop.permute.xlu1 %756 }
  0x9a   :  { %568 = vmatmul.mubr.bf16.gmra.mrb[60].mxu0 %v2556_v56  ;;  %v762_v22 = vpop.permute.xlu0 %761 }
  0x9b   :  { %v767_v23 = vpop.permute.xlu1 %766 }
  0x9e   :  { %v772_v33 = vpop.permute.xlu0 %771 }
  0x9f   :  { %v777_v34 = vpop.permute.xlu1 %776 }
  0xa3   :  { %v782_v44 = vpop.permute.xlu0 %781 }
  0xa4   :  { %v787_v45 = vpop.permute.xlu1 %786 }
  0xa7   :  { %v792_v55 = vpop.permute.xlu0 %791 }
  0xa8   :  { %v797_v56 = vpop.permute.xlu1 %796 }
  0xf5   :  { %v2130_v58 = vpop.f32.mrb[0].mxu0 }
  0xf6   :  { %v2131_v59 = vpop.f32.mrb[1].mxu0 }
  0xf7   :  { %v2132_v60 = vadd.f32 %v2131_v59, %v2130_v58  ;;  %v2133_v61 = vpop.f32.mrb[2].mxu0 }
  0xf8   :  { %v2134_v62 = vpop.f32.mrb[3].mxu0 }
  0xf9   :  { %v2135_v1 = vadd.f32 %v2134_v62, %v2133_v61  ;;  %v899_v2 = vmul.f32 %v2132_v60, %v742_v57 }
  0xfb   :  { %v900_v3 = vmul.f32 %v2135_v1, %v747_v63 }
  0xfd   :  { %v931_v5 = vpack.c.bf16 %v900_v3, %v899_v2  ;;  %v2136_v6 = vpop.f32.mrb[4].mxu0  ;;  %v802_v3 = vpop.permute.xlu0 %801 }
  0xfe   :  { %v2137_v7 = vpop.f32.mrb[5].mxu0 }
  0xff   :  { %v2138_v8 = vadd.f32 %v2137_v7, %v2136_v6  ;;  %v2139_v9 = vpop.f32.mrb[6].mxu0  ;;  %2314 = vmatprep.mubr.bf16.mxu0 %v931_v5 }
 0x100   :  { %v2140_v10 = vpop.f32.mrb[7].mxu0 }
 0x101   :  { %v2141_v11 = vadd.f32 %v2140_v10, %v2139_v9  ;;  %v901_v13 = vmul.f32 %v2138_v8, %v752_v4  ;;  %v807_v4 = vpop.permute.xlu1 %806 }
 0x103   :  { %v902_v14 = vmul.f32 %v2141_v11, %v757_v12 }
 0x105   :  { %v932_v15 = vpack.c.bf16 %v902_v14, %v901_v13  ;;  %v2142_v16 = vpop.f32.mrb[8].mxu0  ;;  %v812_v14 = vpop.permute.xlu0 %811 }
 0x106   :  { %v2143_v17 = vpop.f32.mrb[9].mxu0 }
 0x107   :  { %v2144_v18 = vadd.f32 %v2143_v17, %v2142_v16  ;;  %v2145_v19 = vpop.f32.mrb[10].mxu0  ;;  %2315 = vmatmul.mubr.bf16.vlgmr.msra.gmra.mrb[64].mxu0 %v932_v15  ;;  %v817_v15 = vpop.permute.xlu1 %816 }
 0x108   :  { %v2146_v20 = vpop.f32.mrb[11].mxu0 }
 0x109   :  { %v2147_v21 = vadd.f32 %v2146_v20, %v2145_v19  ;;  %v903_v24 = vmul.f32 %v2144_v18, %v762_v22 }
 0x10b   :  { %v904_v25 = vmul.f32 %v2147_v21, %v767_v23 }
 0x10d   :  { %v2148_v26 = vpop.f32.mrb[12].mxu0  ;;  %v933_v27 = vpack.c.bf16 %v904_v25, %v903_v24  ;;  %v822_v25 = vpop.permute.xlu0 %821 }
 0x10e   :  { %v2149_v28 = vpop.f32.mrb[13].mxu0 }
 0x10f   :  { %v2150_v29 = vadd.f32 %v2149_v28, %v2148_v26  ;;  %v2151_v30 = vpop.f32.mrb[14].mxu0  ;;  %2318 = vmatprep.mubr.bf16.mxu0 %v933_v27  ;;  %v827_v26 = vpop.permute.xlu1 %826 }
 0x110   :  { %v2152_v31 = vpop.f32.mrb[15].mxu0 }
 0x111   :  { %v2153_v32 = vadd.f32 %v2152_v31, %v2151_v30  ;;  %v905_v35 = vmul.f32 %v2150_v29, %v772_v33 }
 0x113   :  { %v906_v36 = vmul.f32 %v2153_v32, %v777_v34 }
 0x115   :  { %v2154_v37 = vpop.f32.mrb[16].mxu0  ;;  %v934_v38 = vpack.c.bf16 %v906_v36, %v905_v35  ;;  %v832_v36 = vpop.permute.xlu0 %831 }
 0x116   :  { %v2155_v39 = vpop.f32.mrb[17].mxu0 }
 0x117   :  { %v2156_v40 = vadd.f32 %v2155_v39, %v2154_v37  ;;  %v2157_v41 = vpop.f32.mrb[18].mxu0  ;;  %2319 = vmatmul.mubr.bf16.gmra.mrb[68].mxu0 %v934_v38  ;;  %v837_v37 = vpop.permute.xlu1 %836 }
 0x118   :  { %v2158_v42 = vpop.f32.mrb[19].mxu0 }
 0x119   :  { %v2159_v43 = vadd.f32 %v2158_v42, %v2157_v41  ;;  %v907_v46 = vmul.f32 %v2156_v40, %v782_v44  ;;  %v2566_v42 = vld [vmem:[%s3390_s6 + $0x8] sm:$0xff]  }
 0x11b   :  { %v908_v47 = vmul.f32 %v2159_v43, %v787_v45 }
 0x11d   :  { %v2160_v48 = vpop.f32.mrb[20].mxu0  ;;  %v935_v49 = vpack.c.bf16 %v908_v47, %v907_v46 }
 0x11e   :  { %v2161_v50 = vpop.f32.mrb[21].mxu0 }
 0x11f   :  { %v2162_v51 = vadd.f32 %v2161_v50, %v2160_v48  ;;  %v2163_v52 = vpop.f32.mrb[22].mxu0  ;;  %2322 = vmatprep.mubr.bf16.mxu0 %v935_v49  ;;  %v2567_v48 = vld [vmem:[%s3390_s6 + $0x10] sm:$0xff]   ;;  %v842_v49 = vpop.permute.xlu0 %841 }
 0x120   :  { %v2164_v53 = vpop.f32.mrb[23].mxu0  ;;  %v847_v50 = vpop.permute.xlu1 %846 }
 0x121   :  { %v2165_v54 = vadd.f32 %v2164_v53, %v2163_v52  ;;  %v909_v57 = vmul.f32 %v2162_v51, %v792_v55  ;;  %v2568_v55 = vld [vmem:[%s3390_s6 + $0x18] sm:$0xff]  }
 0x123   :  { %v910_v58 = vmul.f32 %v2165_v54, %v797_v56 }
 0x125   :  { %v2166_v59 = vpop.f32.mrb[24].mxu0  ;;  %v936_v60 = vpack.c.bf16 %v910_v58, %v909_v57 }
 0x126   :  { %v2167_v61 = vpop.f32.mrb[25].mxu0 }
 0x127   :  { %v2168_v62 = vadd.f32 %v2167_v61, %v2166_v59  ;;  %v2169_v63 = vpop.f32.mrb[26].mxu0  ;;  %2323 = vmatmul.mubr.bf16.gmra.mrb[72].mxu0 %v936_v60  ;;  %v2569_v60 = vld [vmem:[%s3390_s6 + $0x20] sm:$0xff]   ;;  %v852_v61 = vpop.permute.xlu0 %851 }
 0x128   :  { %v2170_v1 = vpop.f32.mrb[27].mxu0 }
 0x129   :  { %v2171_v2 = vadd.f32 %v2170_v1, %v2169_v63  ;;  %v911_v5 = vmul.f32 %v2168_v62, %v802_v3  ;;  %v857_v62 = vpop.permute.xlu1 %856 }
 0x12b   :  { %v912_v6 = vmul.f32 %v2171_v2, %v807_v4  ;;  %v2570_v4 = vld [vmem:[%s3390_s6 + $0x28] sm:$0xff]  }
 0x12d   :  { %v2172_v7 = vpop.f32.mrb[28].mxu0  ;;  %v937_v8 = vpack.c.bf16 %v912_v6, %v911_v5 }
 0x12e   :  { %v2173_v9 = vpop.f32.mrb[29].mxu0 }
 0x12f   :  { %v2174_v10 = vadd.f32 %v2173_v9, %v2172_v7  ;;  %v2175_v11 = vpop.f32.mrb[30].mxu0  ;;  %2326 = vmatprep.mubr.bf16.mxu0 %v937_v8 }
 0x130   :  { %v2176_v12 = vpop.f32.mrb[31].mxu0 }
 0x131   :  { %v2177_v13 = vadd.f32 %v2176_v12, %v2175_v11  ;;  %v913_v16 = vmul.f32 %v2174_v10, %v812_v14  ;;  %v2571_v10 = vld [vmem:[%s3390_s6 + $0x30] sm:$0xff]   ;;  %v862_v11 = vpop.permute.xlu0 %861  ;;  %v867_v12 = vpop.permute.xlu1 %866 }
 0x133   :  { %v914_v17 = vmul.f32 %v2177_v13, %v817_v15 }
 0x135   :  { %v2178_v18 = vpop.f32.mrb[32].mxu0  ;;  %v938_v19 = vpack.c.bf16 %v914_v17, %v913_v16  ;;  %v2572_v17 = vld [vmem:[%s3390_s6 + $0x38] sm:$0xff]  }
 0x136   :  { %v2179_v20 = vpop.f32.mrb[33].mxu0 }
 0x137   :  { %v2180_v21 = vadd.f32 %v2179_v20, %v2178_v18  ;;  %v2181_v22 = vpop.f32.mrb[34].mxu0  ;;  %2327 = vmatmul.mubr.bf16.gmra.mrb[76].mxu0 %v938_v19 }
 0x138   :  { %v2182_v23 = vpop.f32.mrb[35].mxu0 }
 0x139   :  { %v2183_v24 = vadd.f32 %v2182_v23, %v2181_v22  ;;  %v915_v27 = vmul.f32 %v2180_v21, %v822_v25  ;;  %v872_v23 = vpop.permute.xlu0 %871 }
 0x13b   :  { %v916_v28 = vmul.f32 %v2183_v24, %v827_v26  ;;  %v877_v24 = vpop.permute.xlu1 %876 }
 0x13d   :  { %v2184_v29 = vpop.f32.mrb[36].mxu0  ;;  %v939_v30 = vpack.c.bf16 %v916_v28, %v915_v27 }
 0x13e   :  { %v2185_v31 = vpop.f32.mrb[37].mxu0 }
 0x13f   :  { %v2186_v32 = vadd.f32 %v2185_v31, %v2184_v29  ;;  %v2187_v33 = vpop.f32.mrb[38].mxu0  ;;  %2330 = vmatprep.mubr.bf16.mxu1 %v939_v30 }
 0x140   :  { %v2188_v34 = vpop.f32.mrb[39].mxu0 }
 0x141   :  { %v2189_v35 = vadd.f32 %v2188_v34, %v2187_v33  ;;  %v917_v38 = vmul.f32 %v2186_v32, %v832_v36  ;;  %v882_v34 = vpop.permute.xlu0 %881 }
 0x143   :  { %v918_v39 = vmul.f32 %v2189_v35, %v837_v37  ;;  %v887_v35 = vpop.permute.xlu1 %886 }
 0x145   :  { %v2190_v40 = vpop.f32.mrb[40].mxu0  ;;  %v940_v41 = vpack.c.bf16 %v918_v39, %v917_v38 }
 0x146   :  { %v2191_v43 = vpop.f32.mrb[41].mxu0 }
 0x147   :  { %v2192_v44 = vadd.f32 %v2191_v43, %v2190_v40  ;;  %v2193_v45 = vpop.f32.mrb[42].mxu0  ;;  %2331 = vmatmul.mubr.bf16.vlgmr.msra.gmra.mrb[0].mxu1 %v940_v41 }
 0x148   :  { %v2194_v46 = vpop.f32.mrb[43].mxu0  ;;  %2347 = vmatpush3.bf16.msra.mxu1 %v3033_v0 }
 0x149   :  { %v2195_v47 = vadd.f32 %v2194_v46, %v2193_v45  ;;  %2348 = vmatprep.subr.bf16.mxu1 %v2566_v42  ;;  %v919_v51 = vmul.f32 %v2192_v44, %v842_v49  ;;  %v892_v45 = vpop.permute.xlu0 %891  ;;  %v897_v46 = vpop.permute.xlu1 %896 }
 0x14b   :  { %v920_v52 = vmul.f32 %v2195_v47, %v847_v50  ;;  %v2573_v50 = vld [vmem:[%s3391_s5] sm:$0xff]  }
 0x14c   :  { %2349 = vmatpush3.bf16.msra.mxu1 %v2566_v42 }
 0x14d   :  { %v2196_v53 = vpop.f32.mrb[44].mxu0  ;;  %v941_v54 = vpack.c.bf16 %v920_v52, %v919_v51  ;;  %2350 = vmatprep.subr.bf16.mxu1 %v2567_v48 }
 0x14e   :  { %v2197_v56 = vpop.f32.mrb[45].mxu0 }
 0x14f   :  { %v2198_v0 = vadd.f32 %v2197_v56, %v2196_v53  ;;  %v2199_v57 = vpop.f32.mrb[46].mxu0  ;;  %2334 = vmatprep.mubr.bf16.mxu1 %v941_v54 }
 0x150   :  { %v2200_v58 = vpop.f32.mrb[47].mxu0  ;;  %2351 = vmatpush3.bf16.msra.mxu1 %v2567_v48 }
 0x151   :  { %v2201_v59 = vadd.f32 %v2200_v58, %v2199_v57  ;;  %2352 = vmatprep.subr.bf16.mxu1 %v2568_v55  ;;  %v921_v63 = vmul.f32 %v2198_v0, %v852_v61  ;;  %v2574_v0 = vld [vmem:[%s3391_s5 + $0x8] sm:$0xff]   ;;  %v2575_v57 = vld [vmem:[%s3391_s5 + $0x10] sm:$0xff]   ;;  %v2576_v58 = vld [vmem:[%s3391_s5 + $0x18] sm:$0xff]  }
 0x152   :  { %v2577_v61 = vld [vmem:[%s3391_s5 + $0x20] sm:$0xff]  }
 0x153   :  { %v922_v1 = vmul.f32 %v2201_v59, %v857_v62 }
 0x154   :  { %2353 = vmatpush3.bf16.msra.mxu1 %v2568_v55 }
 0x155   :  { %v2202_v2 = vpop.f32.mrb[48].mxu0  ;;  %v942_v3 = vpack.c.bf16 %v922_v1, %v921_v63  ;;  %2354 = vmatprep.subr.bf16.mxu1 %v2569_v60 }
 0x156   :  { %v2203_v5 = vpop.f32.mrb[49].mxu0 }
 0x157   :  { %v2204_v6 = vadd.f32 %v2203_v5, %v2202_v2  ;;  %v2205_v7 = vpop.f32.mrb[50].mxu0  ;;  %2335 = vmatmul.mubr.bf16.gmra.mrb[4].mxu1 %v942_v3  ;;  %v2578_v3 = vld [vmem:[%s3391_s5 + $0x28] sm:$0xff]   ;;  %v2580_v5 = vld [vmem:[%s3391_s5 + $0x38] sm:$0xff]  }
 0x158   :  { %v2206_v8 = vpop.f32.mrb[51].mxu0  ;;  %2355 = vmatpush3.bf16.msra.mxu1 %v2569_v60 }
 0x159   :  { %v2207_v9 = vadd.f32 %v2206_v8, %v2205_v7  ;;  %2356 = vmatprep.subr.bf16.mxu1 %v2570_v4  ;;  %v923_v13 = vmul.f32 %v2204_v6, %v862_v11 }
 0x15b   :  { %v924_v14 = vmul.f32 %v2207_v9, %v867_v12 }
 0x15c   :  { %2357 = vmatpush3.bf16.msra.mxu1 %v2570_v4  ;;  %v2579_v4 = vld [vmem:[%s3391_s5 + $0x30] sm:$0xff]  }
 0x15d   :  { %v2208_v15 = vpop.f32.mrb[52].mxu0  ;;  %v943_v16 = vpack.c.bf16 %v924_v14, %v923_v13  ;;  %2358 = vmatprep.subr.bf16.mxu1 %v2571_v10 }
 0x15e   :  { %v2209_v18 = vpop.f32.mrb[53].mxu0 }
 0x15f   :  { %v2210_v19 = vadd.f32 %v2209_v18, %v2208_v15  ;;  %v2211_v20 = vpop.f32.mrb[54].mxu0  ;;  %2338 = vmatprep.mubr.bf16.mxu1 %v943_v16 }
 0x160   :  { %v2212_v21 = vpop.f32.mrb[55].mxu0  ;;  %2359 = vmatpush3.bf16.msra.mxu1 %v2571_v10 }
 0x161   :  { %v2213_v22 = vadd.f32 %v2212_v21, %v2211_v20  ;;  %2360 = vmatprep.subr.bf16.mxu1 %v2572_v17  ;;  %v925_v25 = vmul.f32 %v2210_v19, %v872_v23 }
 0x163   :  { %v926_v26 = vmul.f32 %v2213_v22, %v877_v24 }
 0x164   :  { %2361 = vmatpush3.bf16.msra.mxu1 %v2572_v17 }
 0x165   :  { %v2214_v27 = vpop.f32.mrb[56].mxu0  ;;  %v944_v28 = vpack.c.bf16 %v926_v26, %v925_v25  ;;  %2394 = vmatprep.subr.bf16.mxu1 %v2573_v50 }
 0x166   :  { %v2215_v29 = vpop.f32.mrb[57].mxu0 }
 0x167   :  { %v2216_v30 = vadd.f32 %v2215_v29, %v2214_v27  ;;  %v2217_v31 = vpop.f32.mrb[58].mxu0  ;;  %2339 = vmatmul.mubr.bf16.gmra.mrb[8].mxu1 %v944_v28 }
 0x168   :  { %v2218_v32 = vpop.f32.mrb[59].mxu0 }
 0x169   :  { %v2219_v33 = vadd.f32 %v2218_v32, %v2217_v31  ;;  %v927_v36 = vmul.f32 %v2216_v30, %v882_v34 }
 0x16b   :  { %v928_v37 = vmul.f32 %v2219_v33, %v887_v35 }
 0x16d   :  { %v2220_v38 = vpop.f32.mrb[60].mxu0  ;;  %v945_v39 = vpack.c.bf16 %v928_v37, %v927_v36 }
 0x16e   :  { %v2221_v40 = vpop.f32.mrb[61].mxu0 }
 0x16f   :  { %v2222_v41 = vadd.f32 %v2221_v40, %v2220_v38  ;;  %v2223_v42 = vpop.f32.mrb[62].mxu0  ;;  %2342 = vmatprep.mubr.bf16.mxu1 %v945_v39 }
 0x170   :  { %v2224_v43 = vpop.f32.mrb[63].mxu0 }
 0x171   :  { %v2225_v44 = vadd.f32 %v2224_v43, %v2223_v42  ;;  %v929_v47 = vmul.f32 %v2222_v41, %v892_v45  ;;  %v2581_v42 = vld [vmem:[%s3392_s2] sm:$0xff]   ;;  %v2582_v43 = vld [vmem:[%s3392_s2 + $0x8] sm:$0xff]   ;;  %v2584_v45 = vld [vmem:[%s3392_s2 + $0x18] sm:$0xff]  }
 0x173   :  { %v930_v48 = vmul.f32 %v2225_v44, %v897_v46  ;;  %v2583_v44 = vld [vmem:[%s3392_s2 + $0x10] sm:$0xff]   ;;  %v2585_v46 = vld [vmem:[%s3392_s2 + $0x20] sm:$0xff]  }
 0x175   :  { %v946_v49 = vpack.c.bf16 %v930_v48, %v929_v47  ;;  %v2586_v47 = vld [vmem:[%s3392_s2 + $0x28] sm:$0xff]   ;;  %v2587_v48 = vld [vmem:[%s3392_s2 + $0x30] sm:$0xff]  }
 0x177   :  { %2343 = vmatmul.mubr.bf16.gmra.mrb[12].mxu1 %v946_v49  ;;  %v2588_v49 = vld [vmem:[%s3392_s2 + $0x38] sm:$0xff]  }
 0x1da   :  { %v2316_v51 = vpop.f32.mrb[64].mxu0 }
 0x1db   :  { %v1045_v52 = vpop.f32.mrb[65].mxu0 }
 0x1dc   :  { %v2317_v53 = vpop.f32.mrb[66].mxu0 }
 0x1dd   :  { %v1221_v54 = vpack.c.bf16 %v2317_v53, %v2316_v51  ;;  %v1048_v55 = vpop.f32.mrb[67].mxu0  ;;  %v2590_v51 = vld [vmem:[%s3392_s2 + $0x48] sm:$0xff]   ;;  %v2592_v53 = vld [vmem:[%s3392_s2 + $0x58] sm:$0xff]  }
 0x1de   :  { %v1220_v56 = vpack.c.bf16 %v1048_v55, %v1045_v52  ;;  %v2591_v52 = vld [vmem:[%s3392_s2 + $0x50] sm:$0xff]   ;;  %v2594_v55 = vld [vmem:[%s3392_s2 + $0x68] sm:$0xff]  }
 0x1e0   :  { %2362 = vmatprep.mubr.bf16.mxu1 %v1220_v56  ;;  %v2595_v56 = vld [vmem:[%s3392_s2 + $0x70] sm:$0xff]  }
 0x1e1   :  { %2363 = vmatmul.mubr.bf16.vlgmr.msra.gmra.mrb[16].mxu1 %v1221_v54  ;;  %v2593_v54 = vld [vmem:[%s3392_s2 + $0x60] sm:$0xff]  }
 0x1e2   :  { %2395 = vmatpush3.bf16.msra.mxu1 %v2573_v50  ;;  %v2589_v50 = vld [vmem:[%s3392_s2 + $0x40] sm:$0xff]  }
 0x1e3   :  { %2396 = vmatprep.subr.bf16.mxu1 %v2574_v0 }
 0x1e6   :  { %2397 = vmatpush3.bf16.msra.mxu1 %v2574_v0  ;;  %v2596_v0 = vld [vmem:[%s3392_s2 + $0x78] sm:$0xff]  }
 0x1e7   :  { %2398 = vmatprep.subr.bf16.mxu1 %v2575_v57 }
 0x1ea   :  { %v2320_v59 = vpop.f32.mrb[68].mxu0  ;;  %2399 = vmatpush3.bf16.msra.mxu1 %v2575_v57 }
 0x1eb   :  { %v1061_v60 = vpop.f32.mrb[69].mxu0  ;;  %2400 = vmatprep.subr.bf16.mxu1 %v2576_v58 }
 0x1ec   :  { %v2321_v62 = vpop.f32.mrb[70].mxu0 }
 0x1ed   :  { %v1223_v63 = vpack.c.bf16 %v2321_v62, %v2320_v59  ;;  %v1064_v1 = vpop.f32.mrb[71].mxu0 }
 0x1ee   :  { %v1222_v2 = vpack.c.bf16 %v1064_v1, %v1061_v60  ;;  %2401 = vmatpush3.bf16.msra.mxu1 %v2576_v58 }
 0x1ef   :  { %2402 = vmatprep.subr.bf16.mxu1 %v2577_v61 }
 0x1f0   :  { %2366 = vmatprep.mubr.bf16.mxu1 %v1222_v2 }
 0x1f1   :  { %2367 = vmatmul.mubr.bf16.gmra.mrb[20].mxu1 %v1223_v63 }
 0x1f2   :  { %2403 = vmatpush3.bf16.msra.mxu1 %v2577_v61 }
 0x1f3   :  { %2404 = vmatprep.subr.bf16.mxu1 %v2578_v3 }
 0x1f6   :  { %2405 = vmatpush3.bf16.msra.mxu1 %v2578_v3 }
 0x1f7   :  { %2406 = vmatprep.subr.bf16.mxu1 %v2579_v4 }
 0x1fa   :  { %v2324_v6 = vpop.f32.mrb[72].mxu0  ;;  %2407 = vmatpush3.bf16.msra.mxu1 %v2579_v4 }
 0x1fb   :  { %v1077_v7 = vpop.f32.mrb[73].mxu0  ;;  %2408 = vmatprep.subr.bf16.mxu1 %v2580_v5 }
 0x1fc   :  { %v2325_v8 = vpop.f32.mrb[74].mxu0 }
 0x1fd   :  { %v1225_v9 = vpack.c.bf16 %v2325_v8, %v2324_v6  ;;  %v1080_v10 = vpop.f32.mrb[75].mxu0 }
 0x1fe   :  { %v1224_v11 = vpack.c.bf16 %v1080_v10, %v1077_v7  ;;  %2409 = vmatpush3.bf16.msra.mxu1 %v2580_v5 }
 0x200   :  { %2370 = vmatprep.mubr.bf16.mxu1 %v1224_v11 }
 0x201   :  { %2371 = vmatmul.mubr.bf16.gmra.mrb[24].mxu1 %v1225_v9 }
 0x20a   :  { %v2328_v12 = vpop.f32.mrb[76].mxu0 }
 0x20b   :  { %v1093_v13 = vpop.f32.mrb[77].mxu0 }
 0x20c   :  { %v2329_v14 = vpop.f32.mrb[78].mxu0 }
 0x20d   :  { %v1227_v15 = vpack.c.bf16 %v2329_v14, %v2328_v12  ;;  %v1096_v16 = vpop.f32.mrb[79].mxu0 }
 0x20e   :  { %v1226_v17 = vpack.c.bf16 %v1096_v16, %v1093_v13 }
 0x210   :  { %2374 = vmatprep.mubr.bf16.mxu1 %v1226_v17 }
 0x211   :  { %2375 = vmatmul.mubr.bf16.gmra.mrb[28].mxu1 %v1227_v15 }
 0x21a   :  { %v2332_v18 = vpop.f32.mrb[0].mxu1 }
 0x21b   :  { %v1109_v19 = vpop.f32.mrb[1].mxu1 }
 0x21c   :  { %v2333_v20 = vpop.f32.mrb[2].mxu1 }
 0x21d   :  { %v1229_v21 = vpack.c.bf16 %v2333_v20, %v2332_v18  ;;  %v1112_v22 = vpop.f32.mrb[3].mxu1 }
 0x21e   :  { %v1228_v23 = vpack.c.bf16 %v1112_v22, %v1109_v19 }
 0x220   :  { %2378 = vmatprep.mubr.bf16.mxu1 %v1228_v23 }
 0x221   :  { %2379 = vmatmul.mubr.bf16.gmra.mrb[32].mxu1 %v1229_v21 }
 0x22a   :  { %v2336_v24 = vpop.f32.mrb[4].mxu1 }
 0x22b   :  { %v1125_v25 = vpop.f32.mrb[5].mxu1 }
 0x22c   :  { %v2337_v26 = vpop.f32.mrb[6].mxu1 }
 0x22d   :  { %v1231_v27 = vpack.c.bf16 %v2337_v26, %v2336_v24  ;;  %v1128_v28 = vpop.f32.mrb[7].mxu1 }
 0x22e   :  { %v1230_v29 = vpack.c.bf16 %v1128_v28, %v1125_v25 }
 0x230   :  { %2382 = vmatprep.mubr.bf16.mxu1 %v1230_v29 }
 0x231   :  { %2383 = vmatmul.mubr.bf16.gmra.mrb[36].mxu1 %v1231_v27 }
 0x23a   :  { %v2340_v30 = vpop.f32.mrb[8].mxu1 }
 0x23b   :  { %v1141_v31 = vpop.f32.mrb[9].mxu1 }
 0x23c   :  { %v2341_v32 = vpop.f32.mrb[10].mxu1 }
 0x23d   :  { %v1233_v33 = vpack.c.bf16 %v2341_v32, %v2340_v30  ;;  %v1144_v34 = vpop.f32.mrb[11].mxu1 }
 0x23e   :  { %v1232_v35 = vpack.c.bf16 %v1144_v34, %v1141_v31 }
 0x240   :  { %2386 = vmatprep.mubr.bf16.mxu1 %v1232_v35 }
 0x241   :  { %2387 = vmatmul.mubr.bf16.gmra.mrb[40].mxu1 %v1233_v33 }
 0x24a   :  { %v2344_v36 = vpop.f32.mrb[12].mxu1 }
 0x24b   :  { %v1157_v37 = vpop.f32.mrb[13].mxu1 }
 0x24c   :  { %v2345_v38 = vpop.f32.mrb[14].mxu1 }
 0x24d   :  { %v1235_v39 = vpack.c.bf16 %v2345_v38, %v2344_v36  ;;  %v1160_v40 = vpop.f32.mrb[15].mxu1 }
 0x24e   :  { %v1234_v41 = vpack.c.bf16 %v1160_v40, %v1157_v37 }
 0x250   :  { %2390 = vmatprep.mubr.bf16.mxu1 %v1234_v41 }
 0x251   :  { %2391 = vmatmul.mubr.bf16.gmra.mrb[44].mxu1 %v1235_v39 }
 0x252   :  { %2410 = vmatprep.mubr.bf16.mxu1 %v2581_v42 }
 0x259   :  { %2411 = vmatmul.mubr.bf16.vlgmr.msra.gmra.mrb[16].mxu1 %v2582_v43 }
 0x25a   :  { %2414 = vmatprep.mubr.bf16.mxu1 %v2583_v44 }
 0x261   :  { %2415 = vmatmul.mubr.bf16.gmra.mrb[20].mxu1 %v2584_v45 }
 0x262   :  { %2418 = vmatprep.mubr.bf16.mxu1 %v2585_v46 }
 0x269   :  { %2419 = vmatmul.mubr.bf16.gmra.mrb[24].mxu1 %v2586_v47 }
 0x26a   :  { %2422 = vmatprep.mubr.bf16.mxu1 %v2587_v48 }
 0x271   :  { %2423 = vmatmul.mubr.bf16.gmra.mrb[28].mxu1 %v2588_v49 }
 0x272   :  { %2426 = vmatprep.mubr.bf16.mxu1 %v2589_v50 }
 0x279   :  { %2427 = vmatmul.mubr.bf16.gmra.mrb[32].mxu1 %v2590_v51 }
 0x27a   :  { %2430 = vmatprep.mubr.bf16.mxu1 %v2591_v52 }
 0x281   :  { %2431 = vmatmul.mubr.bf16.gmra.mrb[36].mxu1 %v2592_v53 }
 0x282   :  { %2434 = vmatprep.mubr.bf16.mxu1 %v2593_v54 }
 0x289   :  { %2435 = vmatmul.mubr.bf16.gmra.mrb[40].mxu1 %v2594_v55 }
 0x28a   :  { %2438 = vmatprep.mubr.bf16.mxu1 %v2595_v56 }
 0x291   :  { %2439 = vmatmul.mubr.bf16.gmra.mrb[44].mxu1 %v2596_v0 }
 0x32c   :  { %v3130_v57 = vpop.f32.mrb[16].mxu1 }
 0x32d   :  { %v3132_v58 = vpop.f32.mrb[17].mxu1  ;;  %v1768_v59 = vmul.f32 %v3130_v57, %v3130_v57 }
 0x32e   :  { %v3136_v60 = vpop.f32.mrb[18].mxu1  ;;  %v1766_v63 = vmul.f32 %v3132_v58, %v3132_v58 }
 0x32f   :  { %1802 = vadd.xlane.f32.xlu0 %v1768_v59  ;;  %v3138_v61 = vpop.f32.mrb[19].mxu1  ;;  %v1769_v3 = vmul.f32 %v3136_v60, %v3136_v60 }
 0x330   :  { %v1767_v62 = vmul.f32 %v3138_v61, %v3138_v61 }
 0x332   :  { %1800 = vadd.xlane.f32.xlu1 %v1767_v62 }
 0x333   :  { %1798 = vadd.xlane.f32.xlu0 %v1766_v63 }
 0x334   :  { %v3144_v1 = vpop.f32.mrb[20].mxu1 }
 0x335   :  { %v3146_v2 = vpop.f32.mrb[21].mxu1  ;;  %v1772_v4 = vmul.f32 %v3144_v1, %v3144_v1 }
 0x336   :  { %v3152_v5 = vpop.f32.mrb[22].mxu1  ;;  %v1770_v7 = vmul.f32 %v3146_v2, %v3146_v2 }
 0x337   :  { %1804 = vadd.xlane.f32.xlu0 %v1769_v3  ;;  %1810 = vadd.xlane.f32.xlu1 %v1772_v4  ;;  %v3154_v6 = vpop.f32.mrb[23].mxu1  ;;  %v1773_v8 = vmul.f32 %v3152_v5, %v3152_v5 }
 0x338   :  { %v1771_v11 = vmul.f32 %v3154_v6, %v3154_v6 }
 0x33b   :  { %1806 = vadd.xlane.f32.xlu1 %v1770_v7  ;;  %1812 = vadd.xlane.f32.xlu0 %v1773_v8 }
 0x33c   :  { %v3160_v9 = vpop.f32.mrb[24].mxu1 }
 0x33d   :  { %v3162_v10 = vpop.f32.mrb[25].mxu1  ;;  %v1776_v12 = vmul.f32 %v3160_v9, %v3160_v9 }
 0x33e   :  { %v3168_v13 = vpop.f32.mrb[26].mxu1  ;;  %v1774_v15 = vmul.f32 %v3162_v10, %v3162_v10 }
 0x33f   :  { %1808 = vadd.xlane.f32.xlu0 %v1771_v11  ;;  %1818 = vadd.xlane.f32.xlu1 %v1776_v12  ;;  %v3170_v14 = vpop.f32.mrb[27].mxu1  ;;  %v1777_v16 = vmul.f32 %v3168_v13, %v3168_v13 }
 0x340   :  { %v1775_v19 = vmul.f32 %v3170_v14, %v3170_v14 }
 0x343   :  { %1814 = vadd.xlane.f32.xlu1 %v1774_v15  ;;  %1820 = vadd.xlane.f32.xlu0 %v1777_v16 }
 0x344   :  { %v3176_v17 = vpop.f32.mrb[28].mxu1 }
 0x345   :  { %v3178_v18 = vpop.f32.mrb[29].mxu1  ;;  %v1780_v20 = vmul.f32 %v3176_v17, %v3176_v17 }
 0x346   :  { %v3184_v21 = vpop.f32.mrb[30].mxu1  ;;  %v1778_v23 = vmul.f32 %v3178_v18, %v3178_v18 }
 0x347   :  { %1816 = vadd.xlane.f32.xlu0 %v1775_v19  ;;  %1826 = vadd.xlane.f32.xlu1 %v1780_v20  ;;  %v3186_v22 = vpop.f32.mrb[31].mxu1  ;;  %v1781_v24 = vmul.f32 %v3184_v21, %v3184_v21 }
 0x348   :  { %v1779_v27 = vmul.f32 %v3186_v22, %v3186_v22 }
 0x34b   :  { %1822 = vadd.xlane.f32.xlu1 %v1778_v23  ;;  %1828 = vadd.xlane.f32.xlu0 %v1781_v24 }
 0x34c   :  { %v3192_v25 = vpop.f32.mrb[32].mxu1 }
 0x34d   :  { %v3194_v26 = vpop.f32.mrb[33].mxu1  ;;  %v1784_v28 = vmul.f32 %v3192_v25, %v3192_v25 }
 0x34e   :  { %v3200_v29 = vpop.f32.mrb[34].mxu1  ;;  %v1782_v31 = vmul.f32 %v3194_v26, %v3194_v26 }
 0x34f   :  { %1824 = vadd.xlane.f32.xlu0 %v1779_v27  ;;  %1834 = vadd.xlane.f32.xlu1 %v1784_v28  ;;  %v3202_v30 = vpop.f32.mrb[35].mxu1  ;;  %v1785_v32 = vmul.f32 %v3200_v29, %v3200_v29 }
 0x350   :  { %v1783_v35 = vmul.f32 %v3202_v30, %v3202_v30 }
 0x353   :  { %1830 = vadd.xlane.f32.xlu1 %v1782_v31  ;;  %1836 = vadd.xlane.f32.xlu0 %v1785_v32 }
 0x354   :  { %v3208_v33 = vpop.f32.mrb[36].mxu1 }
 0x355   :  { %v3210_v34 = vpop.f32.mrb[37].mxu1  ;;  %v1788_v36 = vmul.f32 %v3208_v33, %v3208_v33 }
 0x356   :  { %v3216_v37 = vpop.f32.mrb[38].mxu1  ;;  %v1786_v39 = vmul.f32 %v3210_v34, %v3210_v34 }
 0x357   :  { %1832 = vadd.xlane.f32.xlu0 %v1783_v35  ;;  %1842 = vadd.xlane.f32.xlu1 %v1788_v36  ;;  %v3218_v38 = vpop.f32.mrb[39].mxu1  ;;  %v1789_v40 = vmul.f32 %v3216_v37, %v3216_v37 }
 0x358   :  { %v1787_v43 = vmul.f32 %v3218_v38, %v3218_v38 }
 0x35b   :  { %1838 = vadd.xlane.f32.xlu1 %v1786_v39  ;;  %1844 = vadd.xlane.f32.xlu0 %v1789_v40 }
 0x35c   :  { %v3224_v41 = vpop.f32.mrb[40].mxu1 }
 0x35d   :  { %v3226_v42 = vpop.f32.mrb[41].mxu1  ;;  %v1792_v44 = vmul.f32 %v3224_v41, %v3224_v41 }
 0x35e   :  { %v3232_v45 = vpop.f32.mrb[42].mxu1  ;;  %v1790_v47 = vmul.f32 %v3226_v42, %v3226_v42 }
 0x35f   :  { %1840 = vadd.xlane.f32.xlu0 %v1787_v43  ;;  %1850 = vadd.xlane.f32.xlu1 %v1792_v44  ;;  %v3234_v46 = vpop.f32.mrb[43].mxu1  ;;  %v1793_v48 = vmul.f32 %v3232_v45, %v3232_v45 }
 0x360   :  { %v1791_v51 = vmul.f32 %v3234_v46, %v3234_v46 }
 0x363   :  { %1846 = vadd.xlane.f32.xlu1 %v1790_v47  ;;  %1852 = vadd.xlane.f32.xlu0 %v1793_v48 }
 0x364   :  { %v3240_v49 = vpop.f32.mrb[44].mxu1 }
 0x365   :  { %v3242_v50 = vpop.f32.mrb[45].mxu1  ;;  %v1796_v56 = vmul.f32 %v3240_v49, %v3240_v49 }
 0x366   :  { %v3246_v52 = vpop.f32.mrb[46].mxu1  ;;  %v1794_v53 = vmul.f32 %v3242_v50, %v3242_v50 }
 0x367   :  { %1848 = vadd.xlane.f32.xlu0 %v1791_v51  ;;  %v3250_v54 = vpop.f32.mrb[47].mxu1  ;;  %v1797_v0 = vmul.f32 %v3246_v52, %v3246_v52 }
 0x368   :  { %v1795_v55 = vmul.f32 %v3250_v54, %v3250_v54  ;;  %1854 = vadd.xlane.f32.xlu1 %v1794_v53 }
 0x36b   :  { %1856 = vadd.xlane.f32.xlu0 %v1795_v55 }
 0x36c   :  { %1858 = vadd.xlane.f32.xlu1 %v1796_v56 }
 0x36f   :  { %1860 = vadd.xlane.f32.xlu0 %v1797_v0 }
 0x3bc   :  { %v1803_v59 = vpop.xlane.xlu0 %1802 }
 0x3bd   :  { %v1864_v62 = vmax.f32 %v1803_v59, 1e-24 }
 0x3bf   :  { %2661 = vrsqrt.f32 %v1864_v62  ;;  %v1801_v63 = vpop.xlane.xlu1 %1800 }
 0x3c0   :  { %v1863_v3 = vmax.f32 %v1801_v63, 1e-24  ;;  %v1799_v4 = vpop.xlane.xlu0 %1798 }
 0x3c1   :  { %v1862_v7 = vmax.f32 %v1799_v4, 1e-24 }
 0x3c2   :  { %2663 = vrsqrt.f32 %v1863_v3 }
 0x3c3   :  { %2665 = vrsqrt.f32 %v1862_v7 }
 0x3c4   :  { %v1805_v8 = vpop.xlane.xlu0 %1804  ;;  %v1811_v11 = vpop.xlane.xlu1 %1810 }
 0x3c5   :  { %v1865_v12 = vmax.f32 %v1805_v8, 1e-24  ;;  %v1868_v15 = vmax.f32 %v1811_v11, 1e-24 }
 0x3c7   :  { %2667 = vrsqrt.f32 %v1865_v12 }
 0x3c8   :  { %2669 = vrsqrt.f32 %v1868_v15  ;;  %v1807_v16 = vpop.xlane.xlu1 %1806  ;;  %v1813_v19 = vpop.xlane.xlu0 %1812 }
 0x3c9   :  { %v2662_v20 = vpop.eup %2661  ;;  %v1866_v23 = vmax.f32 %v1807_v16, 1e-24  ;;  %v1869_v24 = vmax.f32 %v1813_v19, 1e-24 }
 0x3ca   :  { %v1928_v27 = vmul.f32 %v2662_v20, %v3130_v57 }
 0x3cb   :  { %2671 = vrsqrt.f32 %v1866_v23 }
 0x3cc   :  { %v2664_v28 = vpop.eup %2663  ;;  %v1960_v31 = vmax.f32 %v1928_v27, 0.0  ;;  %2673 = vrsqrt.f32 %v1869_v24  ;;  %v1809_v32 = vpop.xlane.xlu0 %1808 }
 0x3cd   :  { %v1819_v35 = vpop.xlane.xlu1 %1818  ;;  %v2666_v36 = vpop.eup %2665  ;;  %v1927_v39 = vmul.f32 %v2664_v28, %v3138_v61  ;;  %v1867_v40 = vmax.f32 %v1809_v32, 1e-24 }
 0x3ce   :  { %v1872_v43 = vmax.f32 %v1819_v35, 1e-24  ;;  %1992 = vst [vmem:[%s3393_s7 + $0x10] sm:$0xff] %v1960_v31  ;;  %v1926_v44 = vmul.f32 %v2666_v36, %v3132_v58 }
 0x3cf   :  { %v1959_v47 = vmax.f32 %v1927_v39, 0.0  ;;  %2675 = vrsqrt.f32 %v1867_v40 }
 0x3d0   :  { %v1958_v57 = vmax.f32 %v1926_v44, 0.0  ;;  %2677 = vrsqrt.f32 %v1872_v43  ;;  %v1821_v51 = vpop.xlane.xlu0 %1820 }
 0x3d1   :  { %v1815_v48 = vpop.xlane.xlu1 %1814  ;;  %v2668_v53 = vpop.eup %2667  ;;  %1991 = vst [vmem:[%s3393_s7 + $0x8] sm:$0xff] %v1959_v47  ;;  %v1873_v55 = vmax.f32 %v1821_v51, 1e-24 }
 0x3d2   :  { %v1870_v61 = vmax.f32 %v1815_v48, 1e-24  ;;  %v2670_v56 = vpop.eup %2669  ;;  %1990 = vst [vmem:[%s3393_s7] sm:$0xff] %v1958_v57  ;;  %v1929_v58 = vmul.f32 %v2668_v53, %v3136_v60 }
 0x3d3   :  { %v1932_v0 = vmul.f32 %v2670_v56, %v3144_v1 }
 0x3d4   :  { %2679 = vrsqrt.f32 %v1870_v61  ;;  %v1961_v59 = vmax.f32 %v1929_v58, 0.0  ;;  %v1817_v62 = vpop.xlane.xlu0 %1816 }
 0x3d5   :  { %2681 = vrsqrt.f32 %v1873_v55  ;;  %v1827_v63 = vpop.xlane.xlu1 %1826  ;;  %v2672_v3 = vpop.eup %2671  ;;  %v1964_v4 = vmax.f32 %v1932_v0, 0.0  ;;  %v1871_v7 = vmax.f32 %v1817_v62, 1e-24 }
 0x3d6   :  { %v1876_v8 = vmax.f32 %v1827_v63, 1e-24  ;;  %v2674_v11 = vpop.eup %2673  ;;  %1993 = vst [vmem:[%s3393_s7 + $0x18] sm:$0xff] %v1961_v59  ;;  %v1930_v12 = vmul.f32 %v2672_v3, %v3146_v2 }
 0x3d7   :  { %1996 = vst [vmem:[%s3393_s7 + $0x30] sm:$0xff] %v1964_v4  ;;  %v1933_v60 = vmul.f32 %v2674_v11, %v3152_v5  ;;  %2683 = vrsqrt.f32 %v1871_v7 }
 0x3d8   :  { %v1962_v1 = vmax.f32 %v1930_v12, 0.0  ;;  %2685 = vrsqrt.f32 %v1876_v8  ;;  %v1829_v16 = vpop.xlane.xlu0 %1828 }
 0x3d9   :  { %v1823_v15 = vpop.xlane.xlu1 %1822  ;;  %v2676_v19 = vpop.eup %2675  ;;  %v1965_v20 = vmax.f32 %v1933_v60, 0.0  ;;  %v1877_v24 = vmax.f32 %v1829_v16, 1e-24 }
 0x3da   :  { %v1874_v23 = vmax.f32 %v1823_v15, 1e-24  ;;  %v2678_v27 = vpop.eup %2677  ;;  %1994 = vst [vmem:[%s3393_s7 + $0x20] sm:$0xff] %v1962_v1  ;;  %v1931_v2 = vmul.f32 %v2676_v19, %v3154_v6 }
 0x3db   :  { %1997 = vst [vmem:[%s3393_s7 + $0x38] sm:$0xff] %v1965_v20  ;;  %v1936_v5 = vmul.f32 %v2678_v27, %v3160_v9 }
 0x3dc   :  { %2687 = vrsqrt.f32 %v1874_v23  ;;  %v1963_v28 = vmax.f32 %v1931_v2, 0.0  ;;  %v1825_v31 = vpop.xlane.xlu0 %1824 }
 0x3dd   :  { %2689 = vrsqrt.f32 %v1877_v24  ;;  %v1835_v32 = vpop.xlane.xlu1 %1834  ;;  %v1968_v36 = vmax.f32 %v1936_v5, 0.0  ;;  %v1875_v39 = vmax.f32 %v1825_v31, 1e-24 }
 0x3de   :  { %v2680_v35 = vpop.eup %2679  ;;  %v1880_v40 = vmax.f32 %v1835_v32, 1e-24  ;;  %1995 = vst [vmem:[%s3393_s7 + $0x28] sm:$0xff] %v1963_v28 }
 0x3df   :  { %v2682_v43 = vpop.eup %2681  ;;  %v1934_v6 = vmul.f32 %v2680_v35, %v3162_v10  ;;  %2000 = vst [vmem:[%s3393_s7 + $0x50] sm:$0xff] %v1968_v36  ;;  %2691 = vrsqrt.f32 %v1875_v39 }
 0x3e0   :  { %v1937_v9 = vmul.f32 %v2682_v43, %v3168_v13  ;;  %2693 = vrsqrt.f32 %v1880_v40  ;;  %v1837_v57 = vpop.xlane.xlu0 %1836 }
 0x3e1   :  { %v1966_v44 = vmax.f32 %v1934_v6, 0.0  ;;  %v1831_v47 = vpop.xlane.xlu1 %1830  ;;  %v2684_v48 = vpop.eup %2683  ;;  %v1881_v61 = vmax.f32 %v1837_v57, 1e-24 }
 0x3e2   :  { %v1969_v51 = vmax.f32 %v1937_v9, 0.0  ;;  %v1878_v53 = vmax.f32 %v1831_v47, 1e-24  ;;  %v2686_v55 = vpop.eup %2685  ;;  %v1935_v10 = vmul.f32 %v2684_v48, %v3170_v14 }
 0x3e3   :  { %1998 = vst [vmem:[%s3393_s7 + $0x40] sm:$0xff] %v1966_v44  ;;  %v1940_v13 = vmul.f32 %v2686_v55, %v3176_v17 }
 0x3e4   :  { %2001 = vst [vmem:[%s3393_s7 + $0x58] sm:$0xff] %v1969_v51  ;;  %2695 = vrsqrt.f32 %v1878_v53  ;;  %v1967_v56 = vmax.f32 %v1935_v10, 0.0  ;;  %v1833_v58 = vpop.xlane.xlu0 %1832 }
 0x3e5   :  { %2697 = vrsqrt.f32 %v1881_v61  ;;  %v1843_v0 = vpop.xlane.xlu1 %1842  ;;  %v1972_v62 = vmax.f32 %v1940_v13, 0.0  ;;  %v1879_v63 = vmax.f32 %v1833_v58, 1e-24 }
 0x3e6   :  { %v2688_v59 = vpop.eup %2687  ;;  %v1884_v3 = vmax.f32 %v1843_v0, 1e-24  ;;  %1999 = vst [vmem:[%s3393_s7 + $0x48] sm:$0xff] %v1967_v56 }
 0x3e7   :  { %v2690_v4 = vpop.eup %2689  ;;  %v1938_v14 = vmul.f32 %v2688_v59, %v3178_v18  ;;  %2004 = vst [vmem:[%s3393_s7 + $0x70] sm:$0xff] %v1972_v62  ;;  %2699 = vrsqrt.f32 %v1879_v63 }
 0x3e8   :  { %v1941_v17 = vmul.f32 %v2690_v4, %v3184_v21  ;;  %2701 = vrsqrt.f32 %v1884_v3  ;;  %v1845_v11 = vpop.xlane.xlu0 %1844 }
 0x3e9   :  { %v1970_v7 = vmax.f32 %v1938_v14, 0.0  ;;  %v1839_v8 = vpop.xlane.xlu1 %1838  ;;  %v2692_v12 = vpop.eup %2691  ;;  %v1885_v15 = vmax.f32 %v1845_v11, 1e-24 }
 0x3ea   :  { %v1973_v60 = vmax.f32 %v1941_v17, 0.0  ;;  %v1882_v1 = vmax.f32 %v1839_v8, 1e-24  ;;  %v2694_v16 = vpop.eup %2693  ;;  %v1939_v18 = vmul.f32 %v2692_v12, %v3186_v22 }
 0x3eb   :  { %2002 = vst [vmem:[%s3393_s7 + $0x60] sm:$0xff] %v1970_v7  ;;  %v1944_v21 = vmul.f32 %v2694_v16, %v3192_v25 }
 0x3ec   :  { %2005 = vst [vmem:[%s3393_s7 + $0x78] sm:$0xff] %v1973_v60  ;;  %2703 = vrsqrt.f32 %v1882_v1  ;;  %v1971_v19 = vmax.f32 %v1939_v18, 0.0  ;;  %v1841_v20 = vpop.xlane.xlu0 %1840 }
 0x3ed   :  { %2705 = vrsqrt.f32 %v1885_v15  ;;  %v1851_v23 = vpop.xlane.xlu1 %1850  ;;  %v1976_v27 = vmax.f32 %v1944_v21, 0.0  ;;  %v1883_v2 = vmax.f32 %v1841_v20, 1e-24 }
 0x3ee   :  { %v2696_v24 = vpop.eup %2695  ;;  %v1888_v5 = vmax.f32 %v1851_v23, 1e-24  ;;  %2003 = vst [vmem:[%s3393_s7 + $0x68] sm:$0xff] %v1971_v19 }
 0x3ef   :  { %v2698_v28 = vpop.eup %2697  ;;  %v1942_v22 = vmul.f32 %v2696_v24, %v3194_v26  ;;  %2008 = vst [vmem:[%s3393_s7 + $0x90] sm:$0xff] %v1976_v27  ;;  %2707 = vrsqrt.f32 %v1883_v2 }
 0x3f0   :  { %v1945_v25 = vmul.f32 %v2698_v28, %v3200_v29  ;;  %2709 = vrsqrt.f32 %v1888_v5  ;;  %v1853_v35 = vpop.xlane.xlu0 %1852 }
 0x3f1   :  { %v1974_v31 = vmax.f32 %v1942_v22, 0.0  ;;  %v1847_v32 = vpop.xlane.xlu1 %1846  ;;  %v2700_v36 = vpop.eup %2699  ;;  %v1889_v43 = vmax.f32 %v1853_v35, 1e-24 }
 0x3f2   :  { %v1977_v39 = vmax.f32 %v1945_v25, 0.0  ;;  %v1886_v40 = vmax.f32 %v1847_v32, 1e-24  ;;  %v2702_v6 = vpop.eup %2701  ;;  %v1943_v26 = vmul.f32 %v2700_v36, %v3202_v30 }
 0x3f3   :  { %2006 = vst [vmem:[%s3393_s7 + $0x80] sm:$0xff] %v1974_v31  ;;  %v1948_v29 = vmul.f32 %v2702_v6, %v3208_v33 }
 0x3f4   :  { %2009 = vst [vmem:[%s3393_s7 + $0x98] sm:$0xff] %v1977_v39  ;;  %2711 = vrsqrt.f32 %v1886_v40  ;;  %v1975_v9 = vmax.f32 %v1943_v26, 0.0  ;;  %v1849_v44 = vpop.xlane.xlu0 %1848 }
 0x3f5   :  { %2713 = vrsqrt.f32 %v1889_v43  ;;  %v1980_v57 = vmax.f32 %v1948_v29, 0.0  ;;  %v1887_v48 = vmax.f32 %v1849_v44, 1e-24  ;;  %v1855_v51 = vpop.xlane.xlu1 %1854 }
 0x3f6   :  { %v2704_v47 = vpop.eup %2703  ;;  %2007 = vst [vmem:[%s3393_s7 + $0x88] sm:$0xff] %v1975_v9  ;;  %v1890_v61 = vmax.f32 %v1855_v51, 1e-24 }
 0x3f7   :  { %v2706_v53 = vpop.eup %2705  ;;  %v1946_v30 = vmul.f32 %v2704_v47, %v3210_v34  ;;  %2012 = vst [vmem:[%s3393_s7 + $0xb0] sm:$0xff] %v1980_v57  ;;  %2715 = vrsqrt.f32 %v1887_v48 }
 0x3f8   :  { %v1949_v33 = vmul.f32 %v2706_v53, %v3216_v37  ;;  %2717 = vrsqrt.f32 %v1890_v61  ;;  %v1857_v10 = vpop.xlane.xlu0 %1856 }
 0x3f9   :  { %v1978_v55 = vmax.f32 %v1946_v30, 0.0  ;;  %v2708_v13 = vpop.eup %2707  ;;  %v1891_v58 = vmax.f32 %v1857_v10, 1e-24  ;;  %v1859_v0 = vpop.xlane.xlu1 %1858 }
 0x3fa   :  { %v1981_v56 = vmax.f32 %v1949_v33, 0.0  ;;  %v2710_v59 = vpop.eup %2709  ;;  %v1947_v34 = vmul.f32 %v2708_v13, %v3218_v38  ;;  %v1892_v62 = vmax.f32 %v1859_v0, 1e-24 }
 0x3fb   :  { %2010 = vst [vmem:[%s3393_s7 + $0xa0] sm:$0xff] %v1978_v55  ;;  %v1952_v37 = vmul.f32 %v2710_v59, %v3224_v41  ;;  %2719 = vrsqrt.f32 %v1891_v58 }
 0x3fc   :  { %2013 = vst [vmem:[%s3393_s7 + $0xb8] sm:$0xff] %v1981_v56  ;;  %v1979_v63 = vmax.f32 %v1947_v34, 0.0  ;;  %2721 = vrsqrt.f32 %v1892_v62  ;;  %v1861_v3 = vpop.xlane.xlu0 %1860 }
 0x3fd   :  { %v1984_v14 = vmax.f32 %v1952_v37, 0.0  ;;  %v1893_v17 = vmax.f32 %v1861_v3, 1e-24 }
 0x3fe   :  { %v2712_v4 = vpop.eup %2711  ;;  %2011 = vst [vmem:[%s3393_s7 + $0xa8] sm:$0xff] %v1979_v63 }
 0x3ff   :  { %v2714_v7 = vpop.eup %2713  ;;  %v1950_v38 = vmul.f32 %v2712_v4, %v3226_v42  ;;  %2016 = vst [vmem:[%s3393_s7 + $0xd0] sm:$0xff] %v1984_v14  ;;  %2723 = vrsqrt.f32 %v1893_v17 }
 0x400   :  { %v1953_v41 = vmul.f32 %v2714_v7, %v3232_v45 }
 0x401   :  { %v1982_v8 = vmax.f32 %v1950_v38, 0.0  ;;  %v2716_v11 = vpop.eup %2715 }
 0x402   :  { %v1985_v12 = vmax.f32 %v1953_v41, 0.0  ;;  %v2718_v60 = vpop.eup %2717  ;;  %v1951_v1 = vmul.f32 %v2716_v11, %v3234_v46 }
 0x403   :  { %2014 = vst [vmem:[%s3393_s7 + $0xc0] sm:$0xff] %v1982_v8  ;;  %v1954_v42 = vmul.f32 %v2718_v60, %v3242_v50 }
 0x404   :  { %2017 = vst [vmem:[%s3393_s7 + $0xd8] sm:$0xff] %v1985_v12  ;;  %v1983_v15 = vmax.f32 %v1951_v1, 0.0 }
 0x405   :  { %v2720_v16 = vpop.eup %2719  ;;  %v1986_v45 = vmax.f32 %v1954_v42, 0.0 }
 0x406   :  { %v2722_v18 = vpop.eup %2721  ;;  %2015 = vst [vmem:[%s3393_s7 + $0xc8] sm:$0xff] %v1983_v15  ;;  %v1955_v21 = vmul.f32 %v2720_v16, %v3250_v54 }
 0x407   :  { %2018 = vst [vmem:[%s3393_s7 + $0xe0] sm:$0xff] %v1986_v45  ;;  %v1956_v46 = vmul.f32 %v2722_v18, %v3240_v49 }
 0x408   :  { %v1987_v19 = vmax.f32 %v1955_v21, 0.0 }
 0x409   :  { %v2724_v20 = vpop.eup %2723  ;;  %v1988_v23 = vmax.f32 %v1956_v46, 0.0 }
 0x40a   :  { %2019 = vst [vmem:[%s3393_s7 + $0xe8] sm:$0xff] %v1987_v19  ;;  %v1957_v50 = vmul.f32 %v2724_v20, %v3246_v52 }
 0x40b   :  { %2020 = vst [vmem:[%s3393_s7 + $0xf0] sm:$0xff] %v1988_v23 }
 0x40c   :  { %v1989_v54 = vmax.f32 %v1957_v50, 0.0 }
 0x40e   :  { %2021 = vst [vmem:[%s3393_s7 + $0xf8] sm:$0xff] %v1989_v54 }

</bundles_post_ra>
